<compile_context>
chip_gen: v7x
topology: tpu7x:2x2x1
jax: 0.10.0
libtpu: 0.0.40
codegen_flags: <defaults>
</compile_context>

<pallas_src>
import math
import jax
import jax.numpy as jnp
from jax.experimental import pallas as pl
from jax.experimental.pallas import tpu as pltpu


# ----------------------------------------------------------------------------
# Kernel: full Critic forward for one batch tile.
# ----------------------------------------------------------------------------
def _critic_kernel(xcat_ref, act_ref, w_in_ref, w_stack_ref, w_af_ref,
                   b_ref, w_out_ref, b_out_ref, out_ref):
    bf16 = jnp.bfloat16

    def mm(x, w):
        return jnp.dot(x.astype(bf16), w, preferred_element_type=jnp.float32)

    def silu(x):
        return x * jax.nn.sigmoid(x)   # sigmoid lowers to EUP logistic

    # fused (branch A | branch B) 256-wide trunk ------------------------------
    x = silu(mm(xcat_ref[...], w_in_ref[...]) + b_ref[0])        # fc1_A|fc1_B

    for i in range(3):               # 3 residual blocks, block-diagonal weights
        h = jnp.maximum(mm(x, w_stack_ref[3 * i + 0]) + b_ref[3 * i + 1], 0.0)
        h = jnp.maximum(mm(h, w_stack_ref[3 * i + 1]) + b_ref[3 * i + 2], 0.0)
        h = mm(h, w_stack_ref[3 * i + 2]) + b_ref[3 * i + 3]
        x = x + h

    x = silu(mm(x, w_stack_ref[9]) + b_ref[10])                  # fc2_A|fc2_B
    x = silu(mm(x, w_stack_ref[10]) + b_ref[11])                 # fc3

    # fused head: relu(state_feat @ cfc1_S + action_feat @ cfc1_A + b)
    # with fc4->cfc1 and actnet->cfc1 folded into w_stack[11] / w_af.
    y = jnp.maximum(
        mm(x, w_stack_ref[11]) + mm(act_ref[...], w_af_ref[...]) + b_ref[12],
        0.0)

    # final 256 -> 1 projection via VPU multiply + lane reduction (no 1-wide
    # MXU matmul / dead lanes on the tail of the dependency chain).
    out_ref[...] = (jnp.sum(y * w_out_ref[...], axis=-1, keepdims=True)
                    + b_out_ref[...])


# ----------------------------------------------------------------------------
# Parameter construction (PyTorch-Linear-style uniform init; f32, unfused —
# these are the "source of truth" weights).
# ----------------------------------------------------------------------------
def _init_linear(key, fan_in, fan_out):
    kw, kb = jax.random.split(key)
    bound = 1.0 / math.sqrt(fan_in)
    w = jax.random.uniform(kw, (fan_in, fan_out), jnp.float32, -bound, bound)
    b = jax.random.uniform(kb, (1, fan_out), jnp.float32, -bound, bound)
    return w, b


def make_params(key, state_size, action_size):
    keys = iter(jax.random.split(key, 64))
    p = {}

    def branch(prefix, in_dim):
        p[f"{prefix}_fc1_w"], p[f"{prefix}_fc1_b"] = _init_linear(next(keys), in_dim, 128)
        for i in range(3):
            for j in (1, 2, 3):
                p[f"{prefix}_r{i}_w{j}"], p[f"{prefix}_r{i}_b{j}"] = \
                    _init_linear(next(keys), 128, 128)
        p[f"{prefix}_fc2_w"], p[f"{prefix}_fc2_b"] = _init_linear(next(keys), 128, 128)

    branch("A", state_size[0])
    branch("B", state_size[1])
    p["fc3_w"], p["fc3_b"] = _init_linear(next(keys), 256, 256)
    p["fc4_w"], p["fc4_b"] = _init_linear(next(keys), 256, action_size)
    p["actnet_w"], p["actnet_b"] = _init_linear(next(keys), action_size, action_size)
    p["cfc1_w"], p["cfc1_b"] = _init_linear(next(keys), 2 * action_size, 256)
    p["cfc2_w"], p["cfc2_b"] = _init_linear(next(keys), 256, 1)
    return p


def _block_diag(a, b):
    ia, oa = a.shape
    ib, ob = b.shape
    top = jnp.concatenate([a, jnp.zeros((ia, ob), a.dtype)], axis=1)
    bot = jnp.concatenate([jnp.zeros((ib, oa), b.dtype), b], axis=1)
    return jnp.concatenate([top, bot], axis=0)


def pack_params(p, action_size):
    """Derive the packed/fused bf16 kernel operands from the unfused params."""
    bf16 = jnp.bfloat16

    w_in = _block_diag(p["A_fc1_w"], p["B_fc1_w"]).astype(bf16)   # (inA+inB, 256)

    w_stack, b_stack = [], []
    b_stack.append(jnp.concatenate([p["A_fc1_b"], p["B_fc1_b"]], axis=1))
    for i in range(3):
        for j in (1, 2, 3):
            w_stack.append(_block_diag(p[f"A_r{i}_w{j}"], p[f"B_r{i}_w{j}"]))
            b_stack.append(jnp.concatenate([p[f"A_r{i}_b{j}"],
                                            p[f"B_r{i}_b{j}"]], axis=1))
    w_stack.append(_block_diag(p["A_fc2_w"], p["B_fc2_w"]))
    b_stack.append(jnp.concatenate([p["A_fc2_b"], p["B_fc2_b"]], axis=1))
    w_stack.append(p["fc3_w"])
    b_stack.append(p["fc3_b"])

    # Algebraic fusion of the head: (x @ fc4 + b4) @ cfc1_S  and
    # (a @ actnet + b_a) @ cfc1_A, both feeding a single ReLU(... + cfc1_b).
    cfc1_wS = p["cfc1_w"][:action_size]
    cfc1_wA = p["cfc1_w"][action_size:]
    w_sf = p["fc4_w"] @ cfc1_wS                                   # (256, 256)
    w_af = (p["actnet_w"] @ cfc1_wA).astype(bf16)                 # (A, 256)
    b_head = p["fc4_b"] @ cfc1_wS + p["actnet_b"] @ cfc1_wA + p["cfc1_b"]
    w_stack.append(w_sf)
    b_stack.append(b_head)

    return {
        "w_in": w_in,                                             # bf16
        "w_stack": jnp.stack(w_stack).astype(bf16),               # (12,256,256)
        "w_af": w_af,                                             # (A,256) bf16
        "b_stack": jnp.stack(b_stack).astype(jnp.float32),        # (13,1,256)
        "w_out": p["cfc2_w"].reshape(1, 256).astype(jnp.float32), # (1,256)
        "b_out": p["cfc2_b"].reshape(1, 1).astype(jnp.float32),   # (1,1)
    }


def _round_up(x, m):
    return (x + m - 1) // m * m


@jax.jit
def critic_forward(packed, x_A, x_B, action):
    batch = x_A.shape[0]
    x_A = x_A.reshape(batch, -1)
    x_B = x_B.reshape(batch, -1)
    action = action.reshape(batch, -1).astype(jnp.bfloat16)
    x_cat = jnp.concatenate([x_A, x_B], axis=1).astype(jnp.bfloat16)

    # pad batch to a sublane-friendly tile; tile the batch on a parallel grid
    if batch <= 128:
        tb = _round_up(max(batch, 8), 8)
    else:
        tb = 128
    padded = _round_up(batch, tb)
    if padded != batch:
        x_cat = jnp.pad(x_cat, ((0, padded - batch), (0, 0)))
        action = jnp.pad(action, ((0, padded - batch), (0, 0)))

    in_dim = x_cat.shape[1]
    act_dim = action.shape[1]
    w_in, w_stack, w_af = packed["w_in"], packed["w_stack"], packed["w_af"]
    b_stack, w_out, b_out = packed["b_stack"], packed["w_out"], packed["b_out"]

    const2 = lambda i: (0, 0)
    const3 = lambda i: (0, 0, 0)

    out = pl.pallas_call(
        _critic_kernel,
        out_shape=jax.ShapeDtypeStruct((padded, 1), jnp.float32),
        grid_spec=pltpu.PrefetchScalarGridSpec(
            num_scalar_prefetch=0,
            grid=(padded // tb,),
            in_specs=[
                pl.BlockSpec((tb, in_dim), lambda i: (i, 0)),
                pl.BlockSpec((tb, act_dim), lambda i: (i, 0)),
                pl.BlockSpec(w_in.shape, const2),      # weights: VMEM-resident
                pl.BlockSpec(w_stack.shape, const3),
                pl.BlockSpec(w_af.shape, const2),
                pl.BlockSpec(b_stack.shape, const3),
                pl.BlockSpec(w_out.shape, const2),
                pl.BlockSpec(b_out.shape, const2),
            ],
            out_specs=pl.BlockSpec((tb, 1), lambda i: (i, 0)),
        ),
        compiler_params=pltpu.CompilerParams(
            dimension_semantics=("parallel",),   # shards batch tiles on v7x's 2 TCs
            vmem_limit_bytes=16 << 20,           # small; safe on v7x's 64 MiB VMEM
        ),
    )(x_cat, action, w_in, w_stack, w_af, b_stack, w_out, b_out)
    return out[:batch]


# ----------------------------------------------------------------------------
# Pure-JAX f32 reference (uses the unfused source-of-truth parameters).
# ----------------------------------------------------------------------------
def critic_reference(p, x_A, x_B, action):
    silu = lambda x: x * jax.nn.sigmoid(x)
    relu = jax.nn.relu

    def branch(x, pfx):
        x = silu(x @ p[f"{pfx}_fc1_w"] + p[f"{pfx}_fc1_b"])
        for i in range(3):
            h = relu(x @ p[f"{pfx}_r{i}_w1"] + p[f"{pfx}_r{i}_b1"])
            h = relu(h @ p[f"{pfx}_r{i}_w2"] + p[f"{pfx}_r{i}_b2"])
            h = h @ p[f"{pfx}_r{i}_w3"] + p[f"{pfx}_r{i}_b3"]
            x = x + h
        return silu(x @ p[f"{pfx}_fc2_w"] + p[f"{pfx}_fc2_b"])

    b = x_A.shape[0]
    xa = branch(x_A.reshape(b, -1), "A")
    xb = branch(x_B.reshape(b, -1), "B")
    x = silu(jnp.concatenate([xa, xb], axis=1) @ p["fc3_w"] + p["fc3_b"])
    sf = x @ p["fc4_w"] + p["fc4_b"]
    af = action.reshape(b, -1) @ p["actnet_w"] + p["actnet_b"]
    y = relu(jnp.concatenate([sf, af], axis=1) @ p["cfc1_w"] + p["cfc1_b"])
    return y @ p["cfc2_w"] + p["cfc2_b"]


if __name__ == "__main__":
    state_size = (16, 8)
    action_size = 4
    batch = 2

    key = jax.random.PRNGKey(0)
    kp, ka, kb, kc = jax.random.split(key, 4)

    params = make_params(kp, state_size, action_size)
    packed = pack_params(params, action_size)

    x_A = jax.random.normal(ka, (batch, state_size[0]), jnp.float32)
    x_B = jax.random.normal(kb, (batch, state_size[1]), jnp.float32)
    action = jax.random.normal(kc, (batch, action_size), jnp.float32)

    out = jax.block_until_ready(critic_forward(packed, x_A, x_B, action))
    ref = critic_reference(params, x_A, x_B, action)

    assert out.shape == (batch, 1), out.shape
    # bf16 matmuls + algebraic head fusion -> loosened tolerance vs f32 ref
    err = float(jnp.max(jnp.abs(out - ref) / (jnp.abs(ref) + 1e-1)))
    assert err < 1e-1, (out, ref, err)

    print("KERNEL_OK")
</pallas_src>

<mosaic_0001>
module attributes {stable_mosaic.version = 11 : i64} {
  func.func @_critic_kernel(%arg0: i32, %arg1: memref<8x24xbf16, #tpu.memory_space<vmem>>, %arg2: memref<8x4xbf16, #tpu.memory_space<vmem>>, %arg3: memref<24x256xbf16, #tpu.memory_space<vmem>>, %arg4: memref<12x256x256xbf16, #tpu.memory_space<vmem>>, %arg5: memref<4x256xbf16, #tpu.memory_space<vmem>>, %arg6: memref<13x1x256xf32, #tpu.memory_space<vmem>>, %arg7: memref<1x256xf32, #tpu.memory_space<vmem>>, %arg8: memref<1x1xf32, #tpu.memory_space<vmem>>, %arg9: memref<8x1xf32, #tpu.memory_space<vmem>>) attributes {dimension_semantics = [#tpu.dimension_semantics<parallel>], iteration_bounds = array<i64: 1>, scalar_prefetch = 0 : i64, scratch_operands = 0 : i64, tpu.core_type = #tpu.core_type<tc>, window_params = [{transform_indices = @transform_0, window_bounds = array<i64: 8, 24>}, {transform_indices = @transform_1, window_bounds = array<i64: 8, 4>}, {pipeline_mode = #tpu.pipeline_mode<synchronous>, transform_indices = @transform_2, window_bounds = array<i64: 24, 256>}, {pipeline_mode = #tpu.pipeline_mode<synchronous>, transform_indices = @transform_3, window_bounds = array<i64: 12, 256, 256>}, {pipeline_mode = #tpu.pipeline_mode<synchronous>, transform_indices = @transform_4, window_bounds = array<i64: 4, 256>}, {pipeline_mode = #tpu.pipeline_mode<synchronous>, transform_indices = @transform_5, window_bounds = array<i64: 13, 1, 256>}, {pipeline_mode = #tpu.pipeline_mode<synchronous>, transform_indices = @transform_6, window_bounds = array<i64: 1, 256>}, {pipeline_mode = #tpu.pipeline_mode<synchronous>, transform_indices = @transform_7, window_bounds = array<i64: 1, 1>}, {transform_indices = @transform_8, window_bounds = array<i64: 8, 1>}]} {
    %c0 = arith.constant 0 : index
    %c0_0 = arith.constant 0 : index
    %0 = vector.load %arg1[%c0, %c0_0] : memref<8x24xbf16, #tpu.memory_space<vmem>>, vector<8x24xbf16>
    %c0_1 = arith.constant 0 : index
    %c0_2 = arith.constant 0 : index
    %1 = vector.load %arg3[%c0_1, %c0_2] : memref<24x256xbf16, #tpu.memory_space<vmem>>, vector<24x256xbf16>
    %cst = arith.constant dense<0.000000e+00> : vector<8x256xf32>
    %2 = tpu.matmul %0, %1, %cst {dimension_numbers = #tpu.dot_dimension_numbers<[1], [0], [0], [1], [0, 0, 1, 1], [], []>} : vector<8x24xbf16>, vector<24x256xbf16>, vector<8x256xf32> -> vector<8x256xf32>
    %c0_3 = arith.constant 0 : index
    %c0_4 = arith.constant 0 : index
    %c0_5 = arith.constant 0 : index
    %3 = vector.load %arg6[%c0_3, %c0_4, %c0_5] : memref<13x1x256xf32, #tpu.memory_space<vmem>>, vector<1x1x256xf32>
    %4 = vector.shape_cast %3 : vector<1x1x256xf32> to vector<1x256xf32>
    %5 = vector.broadcast %4 : vector<1x256xf32> to vector<8x256xf32>
    %6 = arith.addf %2, %5 : vector<8x256xf32>
    %7 = arith.negf %6 : vector<8x256xf32>
    %8 = math.exp %7 : vector<8x256xf32>
    %cst_6 = arith.constant 1.000000e+00 : f32
    %9 = vector.broadcast %cst_6 : f32 to vector<8x256xf32>
    %10 = arith.addf %9, %8 : vector<8x256xf32>
    %11 = arith.divf %9, %10 : vector<8x256xf32>
    %12 = arith.mulf %6, %11 : vector<8x256xf32>
    %c0_7 = arith.constant 0 : index
    %c0_8 = arith.constant 0 : index
    %c0_9 = arith.constant 0 : index
    %13 = vector.load %arg4[%c0_7, %c0_8, %c0_9] : memref<12x256x256xbf16, #tpu.memory_space<vmem>>, vector<1x256x256xbf16>
    %14 = vector.shape_cast %13 : vector<1x256x256xbf16> to vector<256x256xbf16>
    %15 = arith.truncf %12 : vector<8x256xf32> to vector<8x256xbf16>
    %cst_10 = arith.constant dense<0.000000e+00> : vector<8x256xf32>
    %16 = tpu.matmul %15, %14, %cst_10 {dimension_numbers = #tpu.dot_dimension_numbers<[1], [0], [0], [1], [0, 0, 1, 1], [], []>} : vector<8x256xbf16>, vector<256x256xbf16>, vector<8x256xf32> -> vector<8x256xf32>
    %c1 = arith.constant 1 : index
    %c0_11 = arith.constant 0 : index
    %c0_12 = arith.constant 0 : index
    %17 = vector.load %arg6[%c1, %c0_11, %c0_12] : memref<13x1x256xf32, #tpu.memory_space<vmem>>, vector<1x1x256xf32>
    %18 = vector.shape_cast %17 : vector<1x1x256xf32> to vector<1x256xf32>
    %19 = vector.broadcast %18 : vector<1x256xf32> to vector<8x256xf32>
    %20 = arith.addf %16, %19 : vector<8x256xf32>
    %cst_13 = arith.constant 0.000000e+00 : f32
    %21 = vector.broadcast %cst_13 : f32 to vector<8x256xf32>
    %22 = arith.maximumf %20, %21 : vector<8x256xf32>
    %c1_14 = arith.constant 1 : index
    %c0_15 = arith.constant 0 : index
    %c0_16 = arith.constant 0 : index
    %23 = vector.load %arg4[%c1_14, %c0_15, %c0_16] : memref<12x256x256xbf16, #tpu.memory_space<vmem>>, vector<1x256x256xbf16>
    %24 = vector.shape_cast %23 : vector<1x256x256xbf16> to vector<256x256xbf16>
    %25 = arith.truncf %22 : vector<8x256xf32> to vector<8x256xbf16>
    %cst_17 = arith.constant dense<0.000000e+00> : vector<8x256xf32>
    %26 = tpu.matmul %25, %24, %cst_17 {dimension_numbers = #tpu.dot_dimension_numbers<[1], [0], [0], [1], [0, 0, 1, 1], [], []>} : vector<8x256xbf16>, vector<256x256xbf16>, vector<8x256xf32> -> vector<8x256xf32>
    %c2 = arith.constant 2 : index
    %c0_18 = arith.constant 0 : index
    %c0_19 = arith.constant 0 : index
    %27 = vector.load %arg6[%c2, %c0_18, %c0_19] : memref<13x1x256xf32, #tpu.memory_space<vmem>>, vector<1x1x256xf32>
    %28 = vector.shape_cast %27 : vector<1x1x256xf32> to vector<1x256xf32>
    %29 = vector.broadcast %28 : vector<1x256xf32> to vector<8x256xf32>
    %30 = arith.addf %26, %29 : vector<8x256xf32>
    %cst_20 = arith.constant 0.000000e+00 : f32
    %31 = vector.broadcast %cst_20 : f32 to vector<8x256xf32>
    %32 = arith.maximumf %30, %31 : vector<8x256xf32>
    %c2_21 = arith.constant 2 : index
    %c0_22 = arith.constant 0 : index
    %c0_23 = arith.constant 0 : index
    %33 = vector.load %arg4[%c2_21, %c0_22, %c0_23] : memref<12x256x256xbf16, #tpu.memory_space<vmem>>, vector<1x256x256xbf16>
    %34 = vector.shape_cast %33 : vector<1x256x256xbf16> to vector<256x256xbf16>
    %35 = arith.truncf %32 : vector<8x256xf32> to vector<8x256xbf16>
    %cst_24 = arith.constant dense<0.000000e+00> : vector<8x256xf32>
    %36 = tpu.matmul %35, %34, %cst_24 {dimension_numbers = #tpu.dot_dimension_numbers<[1], [0], [0], [1], [0, 0, 1, 1], [], []>} : vector<8x256xbf16>, vector<256x256xbf16>, vector<8x256xf32> -> vector<8x256xf32>
    %c3 = arith.constant 3 : index
    %c0_25 = arith.constant 0 : index
    %c0_26 = arith.constant 0 : index
    %37 = vector.load %arg6[%c3, %c0_25, %c0_26] : memref<13x1x256xf32, #tpu.memory_space<vmem>>, vector<1x1x256xf32>
    %38 = vector.shape_cast %37 : vector<1x1x256xf32> to vector<1x256xf32>
    %39 = vector.broadcast %38 : vector<1x256xf32> to vector<8x256xf32>
    %40 = arith.addf %36, %39 : vector<8x256xf32>
    %41 = arith.addf %12, %40 : vector<8x256xf32>
    %c3_27 = arith.constant 3 : index
    %c0_28 = arith.constant 0 : index
    %c0_29 = arith.constant 0 : index
    %42 = vector.load %arg4[%c3_27, %c0_28, %c0_29] : memref<12x256x256xbf16, #tpu.memory_space<vmem>>, vector<1x256x256xbf16>
    %43 = vector.shape_cast %42 : vector<1x256x256xbf16> to vector<256x256xbf16>
    %44 = arith.truncf %41 : vector<8x256xf32> to vector<8x256xbf16>
    %cst_30 = arith.constant dense<0.000000e+00> : vector<8x256xf32>
    %45 = tpu.matmul %44, %43, %cst_30 {dimension_numbers = #tpu.dot_dimension_numbers<[1], [0], [0], [1], [0, 0, 1, 1], [], []>} : vector<8x256xbf16>, vector<256x256xbf16>, vector<8x256xf32> -> vector<8x256xf32>
    %c4 = arith.constant 4 : index
    %c0_31 = arith.constant 0 : index
    %c0_32 = arith.constant 0 : index
    %46 = vector.load %arg6[%c4, %c0_31, %c0_32] : memref<13x1x256xf32, #tpu.memory_space<vmem>>, vector<1x1x256xf32>
    %47 = vector.shape_cast %46 : vector<1x1x256xf32> to vector<1x256xf32>
    %48 = vector.broadcast %47 : vector<1x256xf32> to vector<8x256xf32>
    %49 = arith.addf %45, %48 : vector<8x256xf32>
    %cst_33 = arith.constant 0.000000e+00 : f32
    %50 = vector.broadcast %cst_33 : f32 to vector<8x256xf32>
    %51 = arith.maximumf %49, %50 : vector<8x256xf32>
    %c4_34 = arith.constant 4 : index
    %c0_35 = arith.constant 0 : index
    %c0_36 = arith.constant 0 : index
    %52 = vector.load %arg4[%c4_34, %c0_35, %c0_36] : memref<12x256x256xbf16, #tpu.memory_space<vmem>>, vector<1x256x256xbf16>
    %53 = vector.shape_cast %52 : vector<1x256x256xbf16> to vector<256x256xbf16>
    %54 = arith.truncf %51 : vector<8x256xf32> to vector<8x256xbf16>
    %cst_37 = arith.constant dense<0.000000e+00> : vector<8x256xf32>
    %55 = tpu.matmul %54, %53, %cst_37 {dimension_numbers = #tpu.dot_dimension_numbers<[1], [0], [0], [1], [0, 0, 1, 1], [], []>} : vector<8x256xbf16>, vector<256x256xbf16>, vector<8x256xf32> -> vector<8x256xf32>
    %c5 = arith.constant 5 : index
    %c0_38 = arith.constant 0 : index
    %c0_39 = arith.constant 0 : index
    %56 = vector.load %arg6[%c5, %c0_38, %c0_39] : memref<13x1x256xf32, #tpu.memory_space<vmem>>, vector<1x1x256xf32>
    %57 = vector.shape_cast %56 : vector<1x1x256xf32> to vector<1x256xf32>
    %58 = vector.broadcast %57 : vector<1x256xf32> to vector<8x256xf32>
    %59 = arith.addf %55, %58 : vector<8x256xf32>
    %cst_40 = arith.constant 0.000000e+00 : f32
    %60 = vector.broadcast %cst_40 : f32 to vector<8x256xf32>
    %61 = arith.maximumf %59, %60 : vector<8x256xf32>
    %c5_41 = arith.constant 5 : index
    %c0_42 = arith.constant 0 : index
    %c0_43 = arith.constant 0 : index
    %62 = vector.load %arg4[%c5_41, %c0_42, %c0_43] : memref<12x256x256xbf16, #tpu.memory_space<vmem>>, vector<1x256x256xbf16>
    %63 = vector.shape_cast %62 : vector<1x256x256xbf16> to vector<256x256xbf16>
    %64 = arith.truncf %61 : vector<8x256xf32> to vector<8x256xbf16>
    %cst_44 = arith.constant dense<0.000000e+00> : vector<8x256xf32>
    %65 = tpu.matmul %64, %63, %cst_44 {dimension_numbers = #tpu.dot_dimension_numbers<[1], [0], [0], [1], [0, 0, 1, 1], [], []>} : vector<8x256xbf16>, vector<256x256xbf16>, vector<8x256xf32> -> vector<8x256xf32>
    %c6 = arith.constant 6 : index
    %c0_45 = arith.constant 0 : index
    %c0_46 = arith.constant 0 : index
    %66 = vector.load %arg6[%c6, %c0_45, %c0_46] : memref<13x1x256xf32, #tpu.memory_space<vmem>>, vector<1x1x256xf32>
    %67 = vector.shape_cast %66 : vector<1x1x256xf32> to vector<1x256xf32>
    %68 = vector.broadcast %67 : vector<1x256xf32> to vector<8x256xf32>
    %69 = arith.addf %65, %68 : vector<8x256xf32>
    %70 = arith.addf %41, %69 : vector<8x256xf32>
    %c6_47 = arith.constant 6 : index
    %c0_48 = arith.constant 0 : index
    %c0_49 = arith.constant 0 : index
    %71 = vector.load %arg4[%c6_47, %c0_48, %c0_49] : memref<12x256x256xbf16, #tpu.memory_space<vmem>>, vector<1x256x256xbf16>
    %72 = vector.shape_cast %71 : vector<1x256x256xbf16> to vector<256x256xbf16>
    %73 = arith.truncf %70 : vector<8x256xf32> to vector<8x256xbf16>
    %cst_50 = arith.constant dense<0.000000e+00> : vector<8x256xf32>
    %74 = tpu.matmul %73, %72, %cst_50 {dimension_numbers = #tpu.dot_dimension_numbers<[1], [0], [0], [1], [0, 0, 1, 1], [], []>} : vector<8x256xbf16>, vector<256x256xbf16>, vector<8x256xf32> -> vector<8x256xf32>
    %c7 = arith.constant 7 : index
    %c0_51 = arith.constant 0 : index
    %c0_52 = arith.constant 0 : index
    %75 = vector.load %arg6[%c7, %c0_51, %c0_52] : memref<13x1x256xf32, #tpu.memory_space<vmem>>, vector<1x1x256xf32>
    %76 = vector.shape_cast %75 : vector<1x1x256xf32> to vector<1x256xf32>
    %77 = vector.broadcast %76 : vector<1x256xf32> to vector<8x256xf32>
    %78 = arith.addf %74, %77 : vector<8x256xf32>
    %cst_53 = arith.constant 0.000000e+00 : f32
    %79 = vector.broadcast %cst_53 : f32 to vector<8x256xf32>
    %80 = arith.maximumf %78, %79 : vector<8x256xf32>
    %c7_54 = arith.constant 7 : index
    %c0_55 = arith.constant 0 : index
    %c0_56 = arith.constant 0 : index
    %81 = vector.load %arg4[%c7_54, %c0_55, %c0_56] : memref<12x256x256xbf16, #tpu.memory_space<vmem>>, vector<1x256x256xbf16>
    %82 = vector.shape_cast %81 : vector<1x256x256xbf16> to vector<256x256xbf16>
    %83 = arith.truncf %80 : vector<8x256xf32> to vector<8x256xbf16>
    %cst_57 = arith.constant dense<0.000000e+00> : vector<8x256xf32>
    %84 = tpu.matmul %83, %82, %cst_57 {dimension_numbers = #tpu.dot_dimension_numbers<[1], [0], [0], [1], [0, 0, 1, 1], [], []>} : vector<8x256xbf16>, vector<256x256xbf16>, vector<8x256xf32> -> vector<8x256xf32>
    %c8 = arith.constant 8 : index
    %c0_58 = arith.constant 0 : index
    %c0_59 = arith.constant 0 : index
    %85 = vector.load %arg6[%c8, %c0_58, %c0_59] : memref<13x1x256xf32, #tpu.memory_space<vmem>>, vector<1x1x256xf32>
    %86 = vector.shape_cast %85 : vector<1x1x256xf32> to vector<1x256xf32>
    %87 = vector.broadcast %86 : vector<1x256xf32> to vector<8x256xf32>
    %88 = arith.addf %84, %87 : vector<8x256xf32>
    %cst_60 = arith.constant 0.000000e+00 : f32
    %89 = vector.broadcast %cst_60 : f32 to vector<8x256xf32>
    %90 = arith.maximumf %88, %89 : vector<8x256xf32>
    %c8_61 = arith.constant 8 : index
    %c0_62 = arith.constant 0 : index
    %c0_63 = arith.constant 0 : index
    %91 = vector.load %arg4[%c8_61, %c0_62, %c0_63] : memref<12x256x256xbf16, #tpu.memory_space<vmem>>, vector<1x256x256xbf16>
    %92 = vector.shape_cast %91 : vector<1x256x256xbf16> to vector<256x256xbf16>
    %93 = arith.truncf %90 : vector<8x256xf32> to vector<8x256xbf16>
    %cst_64 = arith.constant dense<0.000000e+00> : vector<8x256xf32>
    %94 = tpu.matmul %93, %92, %cst_64 {dimension_numbers = #tpu.dot_dimension_numbers<[1], [0], [0], [1], [0, 0, 1, 1], [], []>} : vector<8x256xbf16>, vector<256x256xbf16>, vector<8x256xf32> -> vector<8x256xf32>
    %c9 = arith.constant 9 : index
    %c0_65 = arith.constant 0 : index
    %c0_66 = arith.constant 0 : index
    %95 = vector.load %arg6[%c9, %c0_65, %c0_66] : memref<13x1x256xf32, #tpu.memory_space<vmem>>, vector<1x1x256xf32>
    %96 = vector.shape_cast %95 : vector<1x1x256xf32> to vector<1x256xf32>
    %97 = vector.broadcast %96 : vector<1x256xf32> to vector<8x256xf32>
    %98 = arith.addf %94, %97 : vector<8x256xf32>
    %99 = arith.addf %70, %98 : vector<8x256xf32>
    %c9_67 = arith.constant 9 : index
    %c0_68 = arith.constant 0 : index
    %c0_69 = arith.constant 0 : index
    %100 = vector.load %arg4[%c9_67, %c0_68, %c0_69] : memref<12x256x256xbf16, #tpu.memory_space<vmem>>, vector<1x256x256xbf16>
    %101 = vector.shape_cast %100 : vector<1x256x256xbf16> to vector<256x256xbf16>
    %102 = arith.truncf %99 : vector<8x256xf32> to vector<8x256xbf16>
    %cst_70 = arith.constant dense<0.000000e+00> : vector<8x256xf32>
    %103 = tpu.matmul %102, %101, %cst_70 {dimension_numbers = #tpu.dot_dimension_numbers<[1], [0], [0], [1], [0, 0, 1, 1], [], []>} : vector<8x256xbf16>, vector<256x256xbf16>, vector<8x256xf32> -> vector<8x256xf32>
    %c10 = arith.constant 10 : index
    %c0_71 = arith.constant 0 : index
    %c0_72 = arith.constant 0 : index
    %104 = vector.load %arg6[%c10, %c0_71, %c0_72] : memref<13x1x256xf32, #tpu.memory_space<vmem>>, vector<1x1x256xf32>
    %105 = vector.shape_cast %104 : vector<1x1x256xf32> to vector<1x256xf32>
    %106 = vector.broadcast %105 : vector<1x256xf32> to vector<8x256xf32>
    %107 = arith.addf %103, %106 : vector<8x256xf32>
    %108 = arith.negf %107 : vector<8x256xf32>
    %109 = math.exp %108 : vector<8x256xf32>
    %cst_73 = arith.constant 1.000000e+00 : f32
    %110 = vector.broadcast %cst_73 : f32 to vector<8x256xf32>
    %111 = arith.addf %110, %109 : vector<8x256xf32>
    %112 = arith.divf %110, %111 : vector<8x256xf32>
    %113 = arith.mulf %107, %112 : vector<8x256xf32>
    %c10_74 = arith.constant 10 : index
    %c0_75 = arith.constant 0 : index
    %c0_76 = arith.constant 0 : index
    %114 = vector.load %arg4[%c10_74, %c0_75, %c0_76] : memref<12x256x256xbf16, #tpu.memory_space<vmem>>, vector<1x256x256xbf16>
    %115 = vector.shape_cast %114 : vector<1x256x256xbf16> to vector<256x256xbf16>
    %116 = arith.truncf %113 : vector<8x256xf32> to vector<8x256xbf16>
    %cst_77 = arith.constant dense<0.000000e+00> : vector<8x256xf32>
    %117 = tpu.matmul %116, %115, %cst_77 {dimension_numbers = #tpu.dot_dimension_numbers<[1], [0], [0], [1], [0, 0, 1, 1], [], []>} : vector<8x256xbf16>, vector<256x256xbf16>, vector<8x256xf32> -> vector<8x256xf32>
    %c11 = arith.constant 11 : index
    %c0_78 = arith.constant 0 : index
    %c0_79 = arith.constant 0 : index
    %118 = vector.load %arg6[%c11, %c0_78, %c0_79] : memref<13x1x256xf32, #tpu.memory_space<vmem>>, vector<1x1x256xf32>
    %119 = vector.shape_cast %118 : vector<1x1x256xf32> to vector<1x256xf32>
    %120 = vector.broadcast %119 : vector<1x256xf32> to vector<8x256xf32>
    %121 = arith.addf %117, %120 : vector<8x256xf32>
    %122 = arith.negf %121 : vector<8x256xf32>
    %123 = math.exp %122 : vector<8x256xf32>
    %cst_80 = arith.constant 1.000000e+00 : f32
    %124 = vector.broadcast %cst_80 : f32 to vector<8x256xf32>
    %125 = arith.addf %124, %123 : vector<8x256xf32>
    %126 = arith.divf %124, %125 : vector<8x256xf32>
    %127 = arith.mulf %121, %126 : vector<8x256xf32>
    %c11_81 = arith.constant 11 : index
    %c0_82 = arith.constant 0 : index
    %c0_83 = arith.constant 0 : index
    %128 = vector.load %arg4[%c11_81, %c0_82, %c0_83] : memref<12x256x256xbf16, #tpu.memory_space<vmem>>, vector<1x256x256xbf16>
    %129 = vector.shape_cast %128 : vector<1x256x256xbf16> to vector<256x256xbf16>
    %130 = arith.truncf %127 : vector<8x256xf32> to vector<8x256xbf16>
    %cst_84 = arith.constant dense<0.000000e+00> : vector<8x256xf32>
    %131 = tpu.matmul %130, %129, %cst_84 {dimension_numbers = #tpu.dot_dimension_numbers<[1], [0], [0], [1], [0, 0, 1, 1], [], []>} : vector<8x256xbf16>, vector<256x256xbf16>, vector<8x256xf32> -> vector<8x256xf32>
    %c0_85 = arith.constant 0 : index
    %c0_86 = arith.constant 0 : index
    %132 = vector.load %arg2[%c0_85, %c0_86] : memref<8x4xbf16, #tpu.memory_space<vmem>>, vector<8x4xbf16>
    %c0_87 = arith.constant 0 : index
    %c0_88 = arith.constant 0 : index
    %133 = vector.load %arg5[%c0_87, %c0_88] : memref<4x256xbf16, #tpu.memory_space<vmem>>, vector<4x256xbf16>
    %cst_89 = arith.constant dense<0.000000e+00> : vector<8x256xf32>
    %134 = tpu.matmul %132, %133, %cst_89 {dimension_numbers = #tpu.dot_dimension_numbers<[1], [0], [0], [1], [0, 0, 1, 1], [], []>} : vector<8x4xbf16>, vector<4x256xbf16>, vector<8x256xf32> -> vector<8x256xf32>
    %135 = arith.addf %131, %134 : vector<8x256xf32>
    %c12 = arith.constant 12 : index
    %c0_90 = arith.constant 0 : index
    %c0_91 = arith.constant 0 : index
    %136 = vector.load %arg6[%c12, %c0_90, %c0_91] : memref<13x1x256xf32, #tpu.memory_space<vmem>>, vector<1x1x256xf32>
    %137 = vector.shape_cast %136 : vector<1x1x256xf32> to vector<1x256xf32>
    %138 = vector.broadcast %137 : vector<1x256xf32> to vector<8x256xf32>
    %139 = arith.addf %135, %138 : vector<8x256xf32>
    %cst_92 = arith.constant 0.000000e+00 : f32
    %140 = vector.broadcast %cst_92 : f32 to vector<8x256xf32>
    %141 = arith.maximumf %139, %140 : vector<8x256xf32>
    %c0_93 = arith.constant 0 : index
    %c0_94 = arith.constant 0 : index
    %142 = vector.load %arg7[%c0_93, %c0_94] : memref<1x256xf32, #tpu.memory_space<vmem>>, vector<1x256xf32>
    %143 = vector.broadcast %142 : vector<1x256xf32> to vector<8x256xf32>
    %144 = arith.mulf %141, %143 : vector<8x256xf32>
    %cst_95 = arith.constant dense<0.000000e+00> : vector<8xf32>
    %145 = vector.multi_reduction <add>, %144, %cst_95 [1] : vector<8x256xf32> to vector<8xf32>
    %146 = vector.shape_cast %145 : vector<8xf32> to vector<8x1xf32>
    %c0_96 = arith.constant 0 : index
    %c0_97 = arith.constant 0 : index
    %147 = vector.load %arg8[%c0_96, %c0_97] : memref<1x1xf32, #tpu.memory_space<vmem>>, vector<1x1xf32>
    %148 = vector.broadcast %147 : vector<1x1xf32> to vector<8x1xf32>
    %149 = arith.addf %146, %148 : vector<8x1xf32>
    %c0_98 = arith.constant 0 : index
    %c0_99 = arith.constant 0 : index
    %150 = vector.load %arg9[%c0_98, %c0_99] : memref<8x1xf32, #tpu.memory_space<vmem>>, vector<8x1xf32>
    tpu.vector_store %arg9[%c0_98, %c0_99], %149 {strides = array<i32>} : memref<8x1xf32, #tpu.memory_space<vmem>>, vector<8x1xf32>,
    return
  }
  func.func @transform_0(%arg0: i32) -> (i32, i32) {
    %c0_i32 = arith.constant 0 : i32
    %c0_i32_0 = arith.constant 0 : i32
    return %arg0, %c0_i32 : i32, i32
  }
  func.func @transform_1(%arg0: i32) -> (i32, i32) {
    %c0_i32 = arith.constant 0 : i32
    %c0_i32_0 = arith.constant 0 : i32
    return %arg0, %c0_i32 : i32, i32
  }
  func.func @transform_2(%arg0: i32) -> (i32, i32) {
    %c0_i32 = arith.constant 0 : i32
    %c0_i32_0 = arith.constant 0 : i32
    %c0_i32_1 = arith.constant 0 : i32
    return %c0_i32, %c0_i32_0 : i32, i32
  }
  func.func @transform_3(%arg0: i32) -> (i32, i32, i32) {
    %c0_i32 = arith.constant 0 : i32
    %c0_i32_0 = arith.constant 0 : i32
    %c0_i32_1 = arith.constant 0 : i32
    %c0_i32_2 = arith.constant 0 : i32
    return %c0_i32, %c0_i32_0, %c0_i32_1 : i32, i32, i32
  }
  func.func @transform_4(%arg0: i32) -> (i32, i32) {
    %c0_i32 = arith.constant 0 : i32
    %c0_i32_0 = arith.constant 0 : i32
    %c0_i32_1 = arith.constant 0 : i32
    return %c0_i32, %c0_i32_0 : i32, i32
  }
  func.func @transform_5(%arg0: i32) -> (i32, i32, i32) {
    %c0_i32 = arith.constant 0 : i32
    %c0_i32_0 = arith.constant 0 : i32
    %c0_i32_1 = arith.constant 0 : i32
    %c0_i32_2 = arith.constant 0 : i32
    return %c0_i32, %c0_i32_0, %c0_i32_1 : i32, i32, i32
  }
  func.func @transform_6(%arg0: i32) -> (i32, i32) {
    %c0_i32 = arith.constant 0 : i32
    %c0_i32_0 = arith.constant 0 : i32
    %c0_i32_1 = arith.constant 0 : i32
    return %c0_i32, %c0_i32_0 : i32, i32
  }
  func.func @transform_7(%arg0: i32) -> (i32, i32) {
    %c0_i32 = arith.constant 0 : i32
    %c0_i32_0 = arith.constant 0 : i32
    %c0_i32_1 = arith.constant 0 : i32
    return %c0_i32, %c0_i32_0 : i32, i32
  }
  func.func @transform_8(%arg0: i32) -> (i32, i32) {
    %c0_i32 = arith.constant 0 : i32
    %c0_i32_0 = arith.constant 0 : i32
    return %arg0, %c0_i32 : i32, i32
  }
}

</mosaic_0001>

<bundles_post_ra>
// kernel: critic_forward.1
= control target key start
LH: loop header
LB: loop body
LE: loop exit
PB: predicated region body
PF: predicated region fallthrough
CT: control target
= control target key end

     0   :  { %s4662_s0 = inlined_call_operand.vmem [shape: bf16[8,24], index: 0, kind: input, shape index: {}]   ;;  %s4663_s1 = inlined_call_operand.vmem [shape: bf16[8,4], index: 1, kind: input, shape index: {}]   ;;  %s4664_s2 = inlined_call_operand.hbm [shape: bf16[24,256], index: 2, kind: input, shape index: {}]   ;;  %s4665_s3 = inlined_call_operand.hbm [shape: bf16[12,256,256], index: 3, kind: input, shape index: {}]   ;;  %s4666_s4 = inlined_call_operand.hbm [shape: bf16[4,256], index: 4, kind: input, shape index: {}]   ;;  %s4667_s5 = inlined_call_operand.hbm [shape: f32[13,1,256], index: 5, kind: input, shape index: {}]   ;;  %s4668_s6 = inlined_call_operand.hbm [shape: f32[1,256], index: 6, kind: input, shape index: {}]   ;;  %s4669_s7 = inlined_call_operand.<no memory space> [shape: f32[1,1], index: 7, kind: input, shape index: {}]   ;;  %s4670_s8 = inlined_call_operand.vmem [shape: f32[8,1], index: 8, kind: output, shape index: {}]  }
   0x1   :  { %v13_v0 = vstv %s4669_s7 }
   0x2   :  { %14 = vst [vmem:[#allocation2] sm:$0x1] %v13_v0 }
   0x3   :  { %15 = vsyncpa [#allocation4], 0 }
   0x4   :  { %16 = vsyncpa [#allocation6], 0 }
   0x5   :  { %17 = vsyncpa [#allocation9], 0  ;;  %s4458_s29 = smov [#allocation5]   ;;  %s4459_s9 = smov [#allocation8]  }
   0x6   :  { %s39_s30 = sshll.u32 %s4458_s29, 4  ;;  %s61_s10 = sshll.u32 %s4459_s9, 4  ;;  %s40_s30 = int_to_ptr.vmem [resolvable:$true] %s39_s30  ;;  %s4516_s10 = int_to_ptr.vmem [resolvable:$true] %s61_s10 }
   0x7   :  { %s4342_s13 = scalar_lea.hbm %s4665_s3, 49152 }
   0x8   :  { %p4343_p0 = scmp.ne.s32.totalorder %s4665_s3, %s4342_s13  ;;  %p4346_p1 = scmp.lt.u32.totalorder %s4342_s13, %s4665_s3 }
   0xa   :  { %p4348_p2 = pnand %p4346_p1, %p4343_p0 }
   0xc   :  { %4351 = shalt.err (!%p4348_p2)
}
   0xd   :  { %s4352_s17 = scalar_lea.vmem %s40_s30, 49152  ;;  %p4357_p4 = scmp.lt.s32.totalorder %s40_s30, %s40_s30 }
   0xe   :  { %p4353_p3 = scmp.ne.s32.totalorder %s40_s30, %s4352_s17  ;;  %p4358_p5 = scmp.lt.s32.totalorder %s4352_s17, %s4352_s17 }
  0x10   :  { %p4359_p6 = por %p4358_p5, %p4357_p4 }
  0x12   :  { %p4360_p7 = pnand %p4359_p6, %p4353_p3 }
  0x14   :  { %4363 = shalt.err (!%p4360_p7)
}
  0x15   :  { %s4460_s18 = smov 128   ;;  %s4461_s19 = smov 8  }
  0x16   :  { %45 = dma.hbm_to_vmem [thread:$0]  %s4665_s3, 49152, %s40_s30, [#allocation6], %s4460_s18, %s4460_s18, %s4461_s19  }
  0x17   :  { %s4364_s24 = scalar_lea.hbm %s4667_s5, 416 }
  0x18   :  { %p4365_p8 = scmp.ne.s32.totalorder %s4667_s5, %s4364_s24  ;;  %p4368_p9 = scmp.lt.u32.totalorder %s4364_s24, %s4667_s5 }
  0x1a   :  { %p4370_p10 = pnand %p4368_p9, %p4365_p8 }
  0x1c   :  { %4373 = shalt.err (!%p4370_p10)
}
  0x1d   :  { %s4374_s29 = scalar_lea.vmem %s4516_s10, 416  ;;  %p4379_p12 = scmp.lt.s32.totalorder %s4516_s10, %s4516_s10 }
  0x1e   :  { %p4375_p11 = scmp.ne.s32.totalorder %s4516_s10, %s4374_s29  ;;  %p4380_p13 = scmp.lt.s32.totalorder %s4374_s29, %s4374_s29 }
  0x20   :  { %p4381_p0 = por %p4380_p13, %p4379_p12 }
  0x22   :  { %p4382_p1 = pnand %p4381_p0, %p4375_p11 }
  0x24   :  { %4385 = shalt.err (!%p4382_p1)
}
  0x25   :  { %s4462_s3 = smov 32   ;;  %s4463_s30 = smov 2  }
  0x26   :  { %67 = dma.hbm_to_vmem [thread:$0]  %s4667_s5, 416, %s4516_s10, [#allocation9], %s4462_s3, %s4462_s3, %s4463_s30  }
  0x27   :  { %s4464_s12 = smov [#allocation3]   ;;  %s4465_s14 = smov [#allocation7]  }
  0x28   :  { %s27_s13 = sshll.u32 %s4464_s12, 4  ;;  %s52_s15 = sshll.u32 %s4465_s14, 4  ;;  %s28_s13 = int_to_ptr.vmem [resolvable:$true] %s27_s13  ;;  %s53_s15 = int_to_ptr.vmem [resolvable:$true] %s52_s15 }
  0x29   :  { %s4386_s17 = scalar_lea.hbm %s4664_s2, 384 }
  0x2a   :  { %p4387_p2 = scmp.ne.s32.totalorder %s4664_s2, %s4386_s17  ;;  %p4390_p3 = scmp.lt.u32.totalorder %s4386_s17, %s4664_s2 }
  0x2c   :  { %p4392_p4 = pnand %p4390_p3, %p4387_p2 }
  0x2e   :  { %4395 = shalt.err (!%p4392_p4)
}
  0x2f   :  { %s4396_s5 = scalar_lea.vmem %s28_s13, 384  ;;  %p4401_p6 = scmp.lt.s32.totalorder %s28_s13, %s28_s13 }
  0x30   :  { %p4397_p5 = scmp.ne.s32.totalorder %s28_s13, %s4396_s5  ;;  %p4402_p7 = scmp.lt.s32.totalorder %s4396_s5, %s4396_s5 }
  0x32   :  { %p4403_p8 = por %p4402_p7, %p4401_p6 }
  0x34   :  { %p4404_p9 = pnand %p4403_p8, %p4397_p5 }
  0x36   :  { %4407 = shalt.err (!%p4404_p9)
}
  0x37   :  { %33 = dma.hbm_to_vmem [thread:$0]  %s4664_s2, 384, %s28_s13, [#allocation4], %s4460_s18, %s4460_s18, %s4461_s19  }
  0x38   :  { %s4408_s27 = scalar_lea.hbm %s4666_s4, 64 }
  0x39   :  { %p4409_p10 = scmp.ne.s32.totalorder %s4666_s4, %s4408_s27  ;;  %p4412_p11 = scmp.lt.u32.totalorder %s4408_s27, %s4666_s4 }
  0x3b   :  { %p4414_p12 = pnand %p4412_p11, %p4409_p10 }
  0x3d   :  { %4417 = shalt.err (!%p4414_p12)
}
  0x3e   :  { %s4418_s9 = scalar_lea.vmem %s53_s15, 64  ;;  %p4423_p0 = scmp.lt.s32.totalorder %s53_s15, %s53_s15 }
  0x3f   :  { %p4419_p13 = scmp.ne.s32.totalorder %s53_s15, %s4418_s9  ;;  %p4424_p1 = scmp.lt.s32.totalorder %s4418_s9, %s4418_s9 }
  0x41   :  { %p4425_p2 = por %p4424_p1, %p4423_p0 }
  0x43   :  { %p4426_p3 = pnand %p4425_p2, %p4419_p13 }
  0x45   :  { %4429 = shalt.err (!%p4426_p3)
}
  0x46   :  { %55 = dma.hbm_to_vmem [thread:$0]  %s4666_s4, 64, %s53_s15, [#allocation6]  }
  0x47   :  { %s4466_s19 = smov [#allocation10]   ;;  %s4430_s14 = scalar_lea.hbm %s4668_s6, 32 }
  0x48   :  { %s74_s11 = sshll.u32 %s4466_s19, 4  ;;  %p4431_p4 = scmp.ne.s32.totalorder %s4668_s6, %s4430_s14  ;;  %s75_s11 = int_to_ptr.vmem [resolvable:$true] %s74_s11 }
  0x49   :  { %p4434_p5 = scmp.lt.u32.totalorder %s4430_s14, %s4668_s6 }
  0x4b   :  { %p4436_p6 = pnand %p4434_p5, %p4431_p4 }
  0x4d   :  { %4439 = shalt.err (!%p4436_p6)
}
  0x4e   :  { %s4440_s21 = scalar_lea.vmem %s75_s11, 32  ;;  %p4445_p8 = scmp.lt.s32.totalorder %s75_s11, %s75_s11 }
  0x4f   :  { %p4441_p7 = scmp.ne.s32.totalorder %s75_s11, %s4440_s21  ;;  %p4446_p9 = scmp.lt.s32.totalorder %s4440_s21, %s4440_s21 }
  0x51   :  { %p4447_p10 = por %p4446_p9, %p4445_p8 }
  0x53   :  { %p4448_p11 = pnand %p4447_p10, %p4441_p7 }
  0x55   :  { %4451 = shalt.err (!%p4448_p11)
}
  0x56   :  { %77 = dma.hbm_to_vmem [thread:$0]  %s4668_s6, 32, %s75_s11, [#allocation9]  }
  0x57   :  { %4452 = dma.done.wait [#allocation4], 384  }
  0x58   :  { %4453 = vsyncadd [#allocation4], 4294966912 }
  0x59   :  { %4454 = dma.done.wait [#allocation6], 49216  }
  0x5a   :  { %4455 = vsyncadd [#allocation6], 4294918080 }
  0x5b   :  { %4456 = dma.done.wait [#allocation9], 448  }
  0x5c   :  { %4457 = vsyncadd [#allocation9], 4294966848  ;;  %v4467_v1 = vmov 0   ;;  %v3737_v2 = vld [vmem:[#allocation3 + $0x4] ss:$8 sps:$4 sm:$0xff]   ;;  %v99_v4 = vld [vmem:[#allocation3 + $0x10] sm:$0xff] }
  0x5d   :  { %170 = vmatprep.mubr.bf16.mxu1 %v4467_v1  ;;  %v3739_v3 = vld [vmem:[#allocation3] ss:$8 sps:$4 sm:$0xff]   ;;  %vm131_vm0 = vcmask 1043456   ;;  %138 = vmatprep.subr.bf16.mxu1 %v3737_v2  ;;  %v3330_v5 = vcombine.high %v99_v4, %v99_v4  ;;  %v3329_v6 = vcombine.low %v99_v4, %v99_v4  ;;  %v3744_v8 = vld [vmem:[#allocation5 + $0x4] ss:$8 sps:$4 sm:$0xff]   ;;  %vm127_vm1 = vcmask 195584  }
  0x5e   :  { %139 = vmatpush1.bf16.msra.mxu1 %v3739_v3  ;;  %v96_v9 = vld [vmem:[%s4662_s0] sm:$0xf]  ;;  %v3747_v11 = vld [vmem:[#allocation5 + $0x14] ss:$8 sps:$4 sm:$0xff]   ;;  %v3745_v12 = vld [vmem:[#allocation5 + $0x10] ss:$8 sps:$4 sm:$0xff]  }
  0x5f   :  { %3331 = vmatprep.subr.msk.bf16.mxu1 %vm131_vm0, %v3330_v5  ;;  %v133_v7 = vsel %vm131_vm0, %v3329_v6, 0  ;;  %v3742_v10 = vld [vmem:[#allocation5] ss:$8 sps:$4 sm:$0xff]   ;;  %v3750_v13 = vld [vmem:[#allocation5 + $0x24] ss:$8 sps:$4 sm:$0xff]   ;;  %v102_v6 = vlaneseq  ;;  %vm3027_vm2 = vcmask 1041408  }
  0x60   :  { %v3748_v14 = vld [vmem:[#allocation5 + $0x20] ss:$8 sps:$4 sm:$0xff]   ;;  %v3753_v15 = vld [vmem:[#allocation5 + $0x34] ss:$8 sps:$4 sm:$0xff]   ;;  %v3751_v16 = vld [vmem:[#allocation5 + $0x30] ss:$8 sps:$4 sm:$0xff]  }
  0x61   :  { %v3756_v17 = vld [vmem:[#allocation5 + $0x44] ss:$8 sps:$4 sm:$0xff]   ;;  %v3754_v18 = vld [vmem:[#allocation5 + $0x40] ss:$8 sps:$4 sm:$0xff]   ;;  %v3759_v19 = vld [vmem:[#allocation5 + $0x54] ss:$8 sps:$4 sm:$0xff]  }
  0x62   :  { %141 = vmatpush1.bf16.msra.mxu1 %v133_v7  ;;  %v3757_v20 = vld [vmem:[#allocation5 + $0x50] ss:$8 sps:$4 sm:$0xff]   ;;  %v3762_v21 = vld [vmem:[#allocation5 + $0x64] ss:$8 sps:$4 sm:$0xff]   ;;  %v3760_v22 = vld [vmem:[#allocation5 + $0x60] ss:$8 sps:$4 sm:$0xff]  }
  0x63   :  { %400 = vmatprep.subr.bf16.mxu1 %v3744_v8  ;;  %v3765_v23 = vld [vmem:[#allocation5 + $0x74] ss:$8 sps:$4 sm:$0xff]   ;;  %v3763_v24 = vld [vmem:[#allocation5 + $0x70] ss:$8 sps:$4 sm:$0xff]   ;;  %v3768_v25 = vld [vmem:[#allocation5 + $0x84] ss:$8 sps:$4 sm:$0xff]  }
  0x64   :  { %v3766_v26 = vld [vmem:[#allocation5 + $0x80] ss:$8 sps:$4 sm:$0xff]   ;;  %v3771_v27 = vld [vmem:[#allocation5 + $0x94] ss:$8 sps:$4 sm:$0xff]   ;;  %v3769_v28 = vld [vmem:[#allocation5 + $0x90] ss:$8 sps:$4 sm:$0xff]  }
  0x65   :  { %3332 = vmatmul.mubr.msk.bf16.vlgmr.msra.gmra.mrb[0].mxu1 %vm127_vm1, %v96_v9  ;;  %v3774_v29 = vld [vmem:[#allocation5 + $0xa4] ss:$8 sps:$4 sm:$0xff]   ;;  %v3772_v30 = vld [vmem:[#allocation5 + $0xa0] ss:$8 sps:$4 sm:$0xff]   ;;  %v3777_v31 = vld [vmem:[#allocation5 + $0xb4] ss:$8 sps:$4 sm:$0xff]  }
  0x66   :  { %401 = vmatpush1.bf16.msra.mxu1 %v3742_v10  ;;  %v3775_v32 = vld [vmem:[#allocation5 + $0xb0] ss:$8 sps:$4 sm:$0xff]   ;;  %v3780_v33 = vld [vmem:[#allocation5 + $0xc4] ss:$8 sps:$4 sm:$0xff]   ;;  %v3778_v34 = vld [vmem:[#allocation5 + $0xc0] ss:$8 sps:$4 sm:$0xff]  }
  0x67   :  { %402 = vmatprep.subr.bf16.mxu1 %v3747_v11  ;;  %v3783_v35 = vld [vmem:[#allocation5 + $0xd4] ss:$8 sps:$4 sm:$0xff]   ;;  %v3781_v36 = vld [vmem:[#allocation5 + $0xd0] ss:$8 sps:$4 sm:$0xff]   ;;  %v3786_v37 = vld [vmem:[#allocation5 + $0xe4] ss:$8 sps:$4 sm:$0xff]  }
  0x68   :  { %v3784_v38 = vld [vmem:[#allocation5 + $0xe0] ss:$8 sps:$4 sm:$0xff]   ;;  %v3789_v39 = vld [vmem:[#allocation5 + $0xf4] ss:$8 sps:$4 sm:$0xff]   ;;  %v3787_v40 = vld [vmem:[#allocation5 + $0xf0] ss:$8 sps:$4 sm:$0xff]  }
  0x69   :  { %v3790_v41 = vld [vmem:[#allocation5 + $0x104] ss:$8 sps:$4 sm:$0xff]   ;;  %v3792_v42 = vld [vmem:[#allocation5 + $0x100] ss:$8 sps:$4 sm:$0xff]   ;;  %v3793_v43 = vld [vmem:[#allocation5 + $0x114] ss:$8 sps:$4 sm:$0xff]  }
  0x6a   :  { %403 = vmatpush1.bf16.msra.mxu1 %v3745_v12  ;;  %651 = vmatprep.subr.bf16.mxu0 %v3790_v41  ;;  %v3795_v44 = vld [vmem:[#allocation5 + $0x110] ss:$8 sps:$4 sm:$0xff]   ;;  %v3796_v45 = vld [vmem:[#allocation5 + $0x124] ss:$8 sps:$4 sm:$0xff]   ;;  %v3798_v46 = vld [vmem:[#allocation5 + $0x120] ss:$8 sps:$4 sm:$0xff]  }
  0x6b   :  { %404 = vmatprep.subr.bf16.mxu1 %v3750_v13  ;;  %652 = vmatpush1.bf16.msra.mxu0 %v3792_v42  ;;  %v3799_v47 = vld [vmem:[#allocation5 + $0x134] ss:$8 sps:$4 sm:$0xff]   ;;  %v3801_v48 = vld [vmem:[#allocation5 + $0x130] ss:$8 sps:$4 sm:$0xff]   ;;  %v3802_v49 = vld [vmem:[#allocation5 + $0x144] ss:$8 sps:$4 sm:$0xff]  }
  0x6c   :  { %653 = vmatprep.subr.bf16.mxu0 %v3793_v43  ;;  %v3804_v50 = vld [vmem:[#allocation5 + $0x140] ss:$8 sps:$4 sm:$0xff]   ;;  %v3805_v51 = vld [vmem:[#allocation5 + $0x154] ss:$8 sps:$4 sm:$0xff]   ;;  %v3807_v52 = vld [vmem:[#allocation5 + $0x150] ss:$8 sps:$4 sm:$0xff]  }
  0x6d   :  { %v3808_v53 = vld [vmem:[#allocation5 + $0x164] ss:$8 sps:$4 sm:$0xff]   ;;  %v3810_v54 = vld [vmem:[#allocation5 + $0x160] ss:$8 sps:$4 sm:$0xff]   ;;  %v3811_v55 = vld [vmem:[#allocation5 + $0x174] ss:$8 sps:$4 sm:$0xff]  }
  0x6e   :  { %405 = vmatpush1.bf16.msra.mxu1 %v3748_v14  ;;  %v3813_v56 = vld [vmem:[#allocation5 + $0x170] ss:$8 sps:$4 sm:$0xff]   ;;  %v3814_v57 = vld [vmem:[#allocation5 + $0x184] ss:$8 sps:$4 sm:$0xff]   ;;  %v3816_v58 = vld [vmem:[#allocation5 + $0x180] ss:$8 sps:$4 sm:$0xff]  }
  0x6f   :  { %406 = vmatprep.subr.bf16.mxu1 %v3753_v15  ;;  %654 = vmatpush1.bf16.msra.mxu0 %v3795_v44  ;;  %v3817_v59 = vld [vmem:[#allocation5 + $0x194] ss:$8 sps:$4 sm:$0xff]   ;;  %v3819_v60 = vld [vmem:[#allocation5 + $0x190] ss:$8 sps:$4 sm:$0xff]   ;;  %v3820_v61 = vld [vmem:[#allocation5 + $0x1a4] ss:$8 sps:$4 sm:$0xff]  }
  0x70   :  { %655 = vmatprep.subr.bf16.mxu0 %v3796_v45  ;;  %v3822_v62 = vld [vmem:[#allocation5 + $0x1a0] ss:$8 sps:$4 sm:$0xff]   ;;  %v3823_v63 = vld [vmem:[#allocation5 + $0x1b4] ss:$8 sps:$4 sm:$0xff]   ;;  %v3825_v0 = vld [vmem:[#allocation5 + $0x1b0] ss:$8 sps:$4 sm:$0xff]  }
  0x71   :  { %v3826_v2 = vld [vmem:[#allocation5 + $0x1c4] ss:$8 sps:$4 sm:$0xff]   ;;  %v3828_v3 = vld [vmem:[#allocation5 + $0x1c0] ss:$8 sps:$4 sm:$0xff]   ;;  %v3829_v4 = vld [vmem:[#allocation5 + $0x1d4] ss:$8 sps:$4 sm:$0xff]  }
  0x72   :  { %407 = vmatpush1.bf16.msra.mxu1 %v3751_v16  ;;  %v3831_v5 = vld [vmem:[#allocation5 + $0x1d0] ss:$8 sps:$4 sm:$0xff]   ;;  %v103_v7 = vshrl.u32 %v102_v6, 7  ;;  %v100_v9 = vld [vmem:[#allocation8] sm:$0x3]  ;;  %vm3023_vm3 = vcmask 31744  }
  0x73   :  { %408 = vmatprep.subr.bf16.mxu1 %v3756_v17  ;;  %656 = vmatpush1.bf16.msra.mxu0 %v3798_v46  ;;  %v3849_v41 = vld [vmem:[#allocation5 + $0x234] ss:$8 sps:$4 sm:$0xff]   ;;  %v3847_v42 = vld [vmem:[#allocation5 + $0x230] ss:$8 sps:$4 sm:$0xff]   ;;  %v3852_v43 = vld [vmem:[#allocation5 + $0x244] ss:$8 sps:$4 sm:$0xff]  }
  0x74   :  { %657 = vmatprep.subr.bf16.mxu0 %v3799_v47  ;;  %v4593_v8 = vsub.s32 0, %v103_v7  ;;  %v4595_v10 = vsub.s32 1, %v103_v7  ;;  %v3850_v44 = vld [vmem:[#allocation5 + $0x240] ss:$8 sps:$4 sm:$0xff]   ;;  %v3855_v45 = vld [vmem:[#allocation5 + $0x254] ss:$8 sps:$4 sm:$0xff]  }
  0x75   :  { %v3853_v46 = vld [vmem:[#allocation5 + $0x250] ss:$8 sps:$4 sm:$0xff]   ;;  %v3858_v47 = vld [vmem:[#allocation5 + $0x264] ss:$8 sps:$4 sm:$0xff]   ;;  %vm3318_vm4 = vcmask 7168  }
  0x76   :  { %409 = vmatpush1.bf16.msra.mxu1 %v3754_v18  ;;  %v105_v11 = vrot.slane %v100_v9, %v4593_v8  ;;  %v109_v12 = vrot.slane %v100_v9, %v4595_v10 }
  0x77   :  { %410 = vmatprep.subr.bf16.mxu1 %v3759_v19  ;;  %658 = vmatpush1.bf16.msra.mxu0 %v3801_v48  ;;  %v3856_v48 = vld [vmem:[#allocation5 + $0x260] ss:$8 sps:$4 sm:$0xff]  }
  0x78   :  { %659 = vmatprep.subr.bf16.mxu0 %v3802_v49  ;;  %v3861_v49 = vld [vmem:[#allocation5 + $0x274] ss:$8 sps:$4 sm:$0xff]  }
  0x7a   :  { %411 = vmatpush1.bf16.msra.mxu1 %v3757_v20 }
  0x7b   :  { %412 = vmatprep.subr.bf16.mxu1 %v3762_v21  ;;  %660 = vmatpush1.bf16.msra.mxu0 %v3804_v50  ;;  %v3859_v50 = vld [vmem:[#allocation5 + $0x270] ss:$8 sps:$4 sm:$0xff]  }
  0x7c   :  { %661 = vmatprep.subr.bf16.mxu0 %v3805_v51  ;;  %v3864_v51 = vld [vmem:[#allocation5 + $0x284] ss:$8 sps:$4 sm:$0xff]  }
  0x7e   :  { %413 = vmatpush1.bf16.msra.mxu1 %v3760_v22 }
  0x7f   :  { %414 = vmatprep.subr.bf16.mxu1 %v3765_v23  ;;  %662 = vmatpush1.bf16.msra.mxu0 %v3807_v52  ;;  %v3862_v52 = vld [vmem:[#allocation5 + $0x280] ss:$8 sps:$4 sm:$0xff]  }
  0x80   :  { %663 = vmatprep.subr.bf16.mxu0 %v3808_v53  ;;  %v3867_v53 = vld [vmem:[#allocation5 + $0x294] ss:$8 sps:$4 sm:$0xff]  }
  0x82   :  { %415 = vmatpush1.bf16.msra.mxu1 %v3763_v24 }
  0x83   :  { %416 = vmatprep.subr.bf16.mxu1 %v3768_v25  ;;  %664 = vmatpush1.bf16.msra.mxu0 %v3810_v54  ;;  %v3865_v54 = vld [vmem:[#allocation5 + $0x290] ss:$8 sps:$4 sm:$0xff]  }
  0x84   :  { %665 = vmatprep.subr.bf16.mxu0 %v3811_v55  ;;  %v3870_v55 = vld [vmem:[#allocation5 + $0x2a4] ss:$8 sps:$4 sm:$0xff]  }
  0x86   :  { %417 = vmatpush1.bf16.msra.mxu1 %v3766_v26 }
  0x87   :  { %418 = vmatprep.subr.bf16.mxu1 %v3771_v27  ;;  %666 = vmatpush1.bf16.msra.mxu0 %v3813_v56  ;;  %v3868_v56 = vld [vmem:[#allocation5 + $0x2a0] ss:$8 sps:$4 sm:$0xff]  }
  0x88   :  { %667 = vmatprep.subr.bf16.mxu0 %v3814_v57  ;;  %v3873_v57 = vld [vmem:[#allocation5 + $0x2b4] ss:$8 sps:$4 sm:$0xff]  }
  0x8a   :  { %419 = vmatpush1.bf16.msra.mxu1 %v3769_v28 }
  0x8b   :  { %420 = vmatprep.subr.bf16.mxu1 %v3774_v29  ;;  %668 = vmatpush1.bf16.msra.mxu0 %v3816_v58  ;;  %v3871_v58 = vld [vmem:[#allocation5 + $0x2b0] ss:$8 sps:$4 sm:$0xff]  }
  0x8c   :  { %669 = vmatprep.subr.bf16.mxu0 %v3817_v59  ;;  %v3876_v59 = vld [vmem:[#allocation5 + $0x2c4] ss:$8 sps:$4 sm:$0xff]  }
  0x8e   :  { %421 = vmatpush1.bf16.msra.mxu1 %v3772_v30 }
  0x8f   :  { %422 = vmatprep.subr.bf16.mxu1 %v3777_v31  ;;  %670 = vmatpush1.bf16.msra.mxu0 %v3819_v60  ;;  %v3832_v31 = vld [vmem:[#allocation5 + $0x1e4] ss:$8 sps:$4 sm:$0xff]   ;;  %v3874_v60 = vld [vmem:[#allocation5 + $0x2c0] ss:$8 sps:$4 sm:$0xff]  }
  0x90   :  { %671 = vmatprep.subr.bf16.mxu0 %v3820_v61  ;;  %v3879_v61 = vld [vmem:[#allocation5 + $0x2d4] ss:$8 sps:$4 sm:$0xff]  }
  0x92   :  { %423 = vmatpush1.bf16.msra.mxu1 %v3775_v32  ;;  %v3834_v32 = vld [vmem:[#allocation5 + $0x1e0] ss:$8 sps:$4 sm:$0xff]  }
  0x93   :  { %424 = vmatprep.subr.bf16.mxu1 %v3780_v33  ;;  %672 = vmatpush1.bf16.msra.mxu0 %v3822_v62  ;;  %v3835_v33 = vld [vmem:[#allocation5 + $0x1f4] ss:$8 sps:$4 sm:$0xff]   ;;  %v3877_v62 = vld [vmem:[#allocation5 + $0x2d0] ss:$8 sps:$4 sm:$0xff]  }
  0x94   :  { %673 = vmatprep.subr.bf16.mxu0 %v3823_v63  ;;  %v228_v63 = vld [vmem:[#allocation8 + $0x2] sm:$0x3] }
  0x96   :  { %425 = vmatpush1.bf16.msra.mxu1 %v3778_v34  ;;  %v3837_v34 = vld [vmem:[#allocation5 + $0x1f0] ss:$8 sps:$4 sm:$0xff]  }
  0x97   :  { %426 = vmatprep.subr.bf16.mxu1 %v3783_v35  ;;  %674 = vmatpush1.bf16.msra.mxu0 %v3825_v0  ;;  %v3838_v35 = vld [vmem:[#allocation5 + $0x200] ss:$8 sps:$4 sm:$0xff]   ;;  %v233_v0 = vrot.slane %v228_v63, %v4593_v8 }
  0x98   :  { %675 = vmatprep.subr.bf16.mxu0 %v3826_v2  ;;  %v237_v2 = vrot.slane %v228_v63, %v4595_v10  ;;  %v3928_v63 = vld [vmem:[#allocation5 + $0x3e0] ss:$8 sps:$4 sm:$0xff]  }
  0x9a   :  { %427 = vmatpush1.bf16.msra.mxu1 %v3781_v36  ;;  %v3840_v36 = vld [vmem:[#allocation5 + $0x204] ss:$8 sps:$4 sm:$0xff]  }
  0x9b   :  { %428 = vmatprep.subr.bf16.mxu1 %v3786_v37  ;;  %676 = vmatpush1.bf16.msra.mxu0 %v3828_v3  ;;  %v3843_v37 = vld [vmem:[#allocation5 + $0x214] ss:$8 sps:$4 sm:$0xff]  }
  0x9c   :  { %677 = vmatprep.subr.bf16.mxu0 %v3829_v4 }
  0x9e   :  { %429 = vmatpush1.bf16.msra.mxu1 %v3784_v38  ;;  %v3841_v38 = vld [vmem:[#allocation5 + $0x210] ss:$8 sps:$4 sm:$0xff]  }
  0x9f   :  { %430 = vmatprep.subr.bf16.mxu1 %v3789_v39  ;;  %678 = vmatpush1.bf16.msra.mxu0 %v3831_v5  ;;  %v3846_v39 = vld [vmem:[#allocation5 + $0x224] ss:$8 sps:$4 sm:$0xff]  }
  0xa0   :  { %679 = vmatprep.subr.bf16.mxu0 %v3832_v31  ;;  %v3903_v31 = vld [vmem:[#allocation5 + $0x354] ss:$8 sps:$4 sm:$0xff]  }
  0xa2   :  { %431 = vmatpush1.bf16.msra.mxu1 %v3787_v40  ;;  %v3844_v40 = vld [vmem:[#allocation5 + $0x220] ss:$8 sps:$4 sm:$0xff]  }
  0xa3   :  { %680 = vmatpush1.bf16.msra.mxu0 %v3834_v32  ;;  %902 = vmatprep.subr.bf16.mxu1 %v3840_v36  ;;  %v3901_v32 = vld [vmem:[#allocation5 + $0x350] ss:$8 sps:$4 sm:$0xff]  }
  0xa4   :  { %681 = vmatprep.subr.bf16.mxu0 %v3835_v33  ;;  %v3906_v33 = vld [vmem:[#allocation5 + $0x364] ss:$8 sps:$4 sm:$0xff]   ;;  %v3907_v36 = vld [vmem:[#allocation5 + $0x370] ss:$8 sps:$4 sm:$0xff]  }
  0xa7   :  { %682 = vmatpush1.bf16.msra.mxu0 %v3837_v34  ;;  %v3904_v34 = vld [vmem:[#allocation5 + $0x360] ss:$8 sps:$4 sm:$0xff]  }
 0x138   :  { %v172_v13 = vpop.f32.mrb[0].mxu1 }
 0x139   :  { %v173_v14 = vadd.f32 %v172_v13, %v105_v11  ;;  %v174_v15 = vpop.f32.mrb[1].mxu1 }
 0x13a   :  { %v175_v16 = vadd.f32 %v174_v15, %v109_v12  ;;  %v176_v17 = vpop.f32.mrb[2].mxu1  ;;  %v3882_v15 = vld [vmem:[#allocation5 + $0x2e4] ss:$8 sps:$4 sm:$0xff]  }
 0x13b   :  { %v3333_v18 = vmul.f32 -1.442695, %v173_v14  ;;  %v177_v19 = vpop.f32.mrb[3].mxu1  ;;  %v3885_v17 = vld [vmem:[#allocation5 + $0x2f4] ss:$8 sps:$4 sm:$0xff]  }
 0x13c   :  { %v3334_v20 = vmul.f32 -1.442695, %v175_v16  ;;  %v3886_v19 = vld [vmem:[#allocation5 + $0x300] ss:$8 sps:$4 sm:$0xff]  }
 0x13d   :  { %4318 = vpow2.f32 %v3333_v18  ;;  %v3883_v18 = vld [vmem:[#allocation5 + $0x2f0] ss:$8 sps:$4 sm:$0xff]  }
 0x13e   :  { %4320 = vpow2.f32 %v3334_v20  ;;  %v3888_v20 = vld [vmem:[#allocation5 + $0x304] ss:$8 sps:$4 sm:$0xff]  }
 0x13f   :  { %1153 = vmatprep.subr.bf16.mxu0 %v3888_v20  ;;  %v3955_v20 = vld [vmem:[#allocation5 + $0x470] ss:$8 sps:$4 sm:$0xff]  }
 0x147   :  { %v4319_v21 = vpop.eup %4318 }
 0x148   :  { %v4321_v22 = vpop.eup %4320  ;;  %v185_v23 = vadd.f32 1.0, %v4319_v21  ;;  %v3891_v21 = vld [vmem:[#allocation5 + $0x314] ss:$8 sps:$4 sm:$0xff]  }
 0x149   :  { %v186_v24 = vadd.f32 1.0, %v4321_v22  ;;  %v3889_v22 = vld [vmem:[#allocation5 + $0x310] ss:$8 sps:$4 sm:$0xff]  }
 0x14a   :  { %4322 = vrcp.f32 %v185_v23  ;;  %v3894_v23 = vld [vmem:[#allocation5 + $0x324] ss:$8 sps:$4 sm:$0xff]  }
 0x14b   :  { %4324 = vrcp.f32 %v186_v24  ;;  %v3892_v24 = vld [vmem:[#allocation5 + $0x320] ss:$8 sps:$4 sm:$0xff]  }
 0x154   :  { %v4323_v25 = vpop.eup %4322 }
 0x155   :  { %v4325_v26 = vpop.eup %4324  ;;  %v4599_v27 = vmul.f32 %v4323_v25, %v173_v14  ;;  %v3897_v25 = vld [vmem:[#allocation5 + $0x334] ss:$8 sps:$4 sm:$0xff]  }
 0x156   :  { %v4601_v28 = vmul.f32 %v4325_v26, %v175_v16  ;;  %v3880_v16 = vld [vmem:[#allocation5 + $0x2e0] ss:$8 sps:$4 sm:$0xff]   ;;  %v3895_v26 = vld [vmem:[#allocation5 + $0x330] ss:$8 sps:$4 sm:$0xff]  }
 0x157   :  { %v225_v30 = vpack.c.bf16 %v4599_v27, %v4599_v27 }
 0x158   :  { %v226_v29 = vpack.c.bf16 %v4601_v28, %v4601_v28 }
 0x15a   :  { %432 = vmatprep.mubr.bf16.mxu1 %v226_v29  ;;  %v3900_v29 = vld [vmem:[#allocation5 + $0x344] ss:$8 sps:$4 sm:$0xff]  }
 0x15b   :  { %433 = vmatmul.mubr.bf16.vlgmr.msra.gmra.mrb[4].mxu1 %v225_v30  ;;  %v3898_v30 = vld [vmem:[#allocation5 + $0x340] ss:$8 sps:$4 sm:$0xff]  }
 0x15c   :  { %903 = vmatpush1.bf16.msra.mxu1 %v3838_v35  ;;  %v3909_v35 = vld [vmem:[#allocation5 + $0x374] ss:$8 sps:$4 sm:$0xff]  }
 0x15d   :  { %904 = vmatprep.subr.bf16.mxu1 %v3843_v37  ;;  %v3912_v37 = vld [vmem:[#allocation5 + $0x384] ss:$8 sps:$4 sm:$0xff]  }
 0x160   :  { %905 = vmatpush1.bf16.msra.mxu1 %v3841_v38  ;;  %v3910_v38 = vld [vmem:[#allocation5 + $0x380] ss:$8 sps:$4 sm:$0xff]  }
 0x161   :  { %906 = vmatprep.subr.bf16.mxu1 %v3846_v39  ;;  %v3915_v39 = vld [vmem:[#allocation5 + $0x394] ss:$8 sps:$4 sm:$0xff]  }
 0x164   :  { %907 = vmatpush1.bf16.msra.mxu1 %v3844_v40  ;;  %v3913_v40 = vld [vmem:[#allocation5 + $0x390] ss:$8 sps:$4 sm:$0xff]  }
 0x165   :  { %908 = vmatprep.subr.bf16.mxu1 %v3849_v41  ;;  %v3918_v41 = vld [vmem:[#allocation5 + $0x3a4] ss:$8 sps:$4 sm:$0xff]  }
 0x168   :  { %909 = vmatpush1.bf16.msra.mxu1 %v3847_v42  ;;  %v3916_v42 = vld [vmem:[#allocation5 + $0x3a0] ss:$8 sps:$4 sm:$0xff]  }
 0x169   :  { %910 = vmatprep.subr.bf16.mxu1 %v3852_v43  ;;  %v3921_v43 = vld [vmem:[#allocation5 + $0x3b4] ss:$8 sps:$4 sm:$0xff]  }
 0x16c   :  { %911 = vmatpush1.bf16.msra.mxu1 %v3850_v44  ;;  %v3919_v44 = vld [vmem:[#allocation5 + $0x3b0] ss:$8 sps:$4 sm:$0xff]  }
 0x16d   :  { %912 = vmatprep.subr.bf16.mxu1 %v3855_v45  ;;  %v3924_v45 = vld [vmem:[#allocation5 + $0x3c4] ss:$8 sps:$4 sm:$0xff]  }
 0x170   :  { %913 = vmatpush1.bf16.msra.mxu1 %v3853_v46  ;;  %v3922_v46 = vld [vmem:[#allocation5 + $0x3c0] ss:$8 sps:$4 sm:$0xff]  }
 0x171   :  { %914 = vmatprep.subr.bf16.mxu1 %v3858_v47  ;;  %v3927_v47 = vld [vmem:[#allocation5 + $0x3d4] ss:$8 sps:$4 sm:$0xff]  }
 0x174   :  { %915 = vmatpush1.bf16.msra.mxu1 %v3856_v48  ;;  %v3925_v48 = vld [vmem:[#allocation5 + $0x3d0] ss:$8 sps:$4 sm:$0xff]  }
 0x175   :  { %916 = vmatprep.subr.bf16.mxu1 %v3861_v49  ;;  %v479_v49 = vld [vmem:[#allocation8 + $0x4] sm:$0x3] }
 0x178   :  { %917 = vmatpush1.bf16.msra.mxu1 %v3859_v50  ;;  %v484_v50 = vrot.slane %v479_v49, %v4593_v8 }
 0x179   :  { %918 = vmatprep.subr.bf16.mxu1 %v3864_v51  ;;  %v488_v51 = vrot.slane %v479_v49, %v4595_v10  ;;  %v3976_v49 = vld [vmem:[#allocation5 + $0x4e0] ss:$8 sps:$4 sm:$0xff]  }
 0x17c   :  { %919 = vmatpush1.bf16.msra.mxu1 %v3862_v52 }
 0x17d   :  { %920 = vmatprep.subr.bf16.mxu1 %v3867_v53 }
 0x180   :  { %921 = vmatpush1.bf16.msra.mxu1 %v3865_v54 }
 0x181   :  { %922 = vmatprep.subr.bf16.mxu1 %v3870_v55 }
 0x184   :  { %923 = vmatpush1.bf16.msra.mxu1 %v3868_v56 }
 0x185   :  { %924 = vmatprep.subr.bf16.mxu1 %v3873_v57 }
 0x188   :  { %925 = vmatpush1.bf16.msra.mxu1 %v3871_v58 }
 0x189   :  { %926 = vmatprep.subr.bf16.mxu1 %v3876_v59 }
 0x18c   :  { %927 = vmatpush1.bf16.msra.mxu1 %v3874_v60 }
 0x18d   :  { %928 = vmatprep.subr.bf16.mxu1 %v3879_v61 }
 0x190   :  { %929 = vmatpush1.bf16.msra.mxu1 %v3877_v62  ;;  %v3930_v62 = vld [vmem:[#allocation5 + $0x3e4] ss:$8 sps:$4 sm:$0xff]  }
 0x191   :  { %930 = vmatprep.subr.bf16.mxu1 %v3882_v15  ;;  %v3951_v15 = vld [vmem:[#allocation5 + $0x454] ss:$8 sps:$4 sm:$0xff]  }
 0x194   :  { %931 = vmatpush1.bf16.msra.mxu1 %v3880_v16  ;;  %v3949_v16 = vld [vmem:[#allocation5 + $0x450] ss:$8 sps:$4 sm:$0xff]  }
 0x195   :  { %932 = vmatprep.subr.bf16.mxu1 %v3885_v17  ;;  %v3954_v17 = vld [vmem:[#allocation5 + $0x464] ss:$8 sps:$4 sm:$0xff]  }
 0x198   :  { %933 = vmatpush1.bf16.msra.mxu1 %v3883_v18  ;;  %v3952_v18 = vld [vmem:[#allocation5 + $0x460] ss:$8 sps:$4 sm:$0xff]  }
 0x22e   :  { %v434_v3 = vpop.f32.mrb[4].mxu1 }
 0x22f   :  { %v435_v4 = vadd.f32 %v434_v3, %v233_v0  ;;  %v436_v5 = vpop.f32.mrb[5].mxu1  ;;  %v3933_v0 = vld [vmem:[#allocation5 + $0x3f4] ss:$8 sps:$4 sm:$0xff]   ;;  %v3934_v3 = vld [vmem:[#allocation5 + $0x400] ss:$8 sps:$4 sm:$0xff]  }
 0x230   :  { %v437_v6 = vadd.f32 %v436_v5, %v237_v2  ;;  %v438_v7 = vpop.f32.mrb[6].mxu1  ;;  %v3931_v2 = vld [vmem:[#allocation5 + $0x3f0] ss:$8 sps:$4 sm:$0xff]   ;;  %v3939_v5 = vld [vmem:[#allocation5 + $0x414] ss:$8 sps:$4 sm:$0xff]  }
 0x231   :  { %v441_v9 = vmax.f32 %v435_v4, 0.0  ;;  %v439_v11 = vpop.f32.mrb[7].mxu1  ;;  %v3936_v4 = vld [vmem:[#allocation5 + $0x404] ss:$8 sps:$4 sm:$0xff]  }
 0x232   :  { %v442_v12 = vmax.f32 %v437_v6, 0.0  ;;  %1404 = vmatprep.subr.bf16.mxu1 %v3936_v4  ;;  %v3937_v6 = vld [vmem:[#allocation5 + $0x410] ss:$8 sps:$4 sm:$0xff]   ;;  %v3942_v7 = vld [vmem:[#allocation5 + $0x424] ss:$8 sps:$4 sm:$0xff]  }
 0x233   :  { %v476_v14 = vpack.c.bf16 %v441_v9, %v441_v9  ;;  %v3940_v9 = vld [vmem:[#allocation5 + $0x420] ss:$8 sps:$4 sm:$0xff]   ;;  %v3945_v11 = vld [vmem:[#allocation5 + $0x434] ss:$8 sps:$4 sm:$0xff]  }
 0x234   :  { %v477_v13 = vpack.c.bf16 %v442_v12, %v442_v12  ;;  %v3943_v12 = vld [vmem:[#allocation5 + $0x430] ss:$8 sps:$4 sm:$0xff]   ;;  %v4006_v4 = vld [vmem:[#allocation5 + $0x580] ss:$8 sps:$4 sm:$0xff]  }
 0x236   :  { %683 = vmatprep.mubr.bf16.mxu0 %v477_v13  ;;  %v3948_v13 = vld [vmem:[#allocation5 + $0x444] ss:$8 sps:$4 sm:$0xff]  }
 0x237   :  { %684 = vmatmul.mubr.bf16.vlgmr.msra.gmra.mrb[0].mxu0 %v476_v14  ;;  %v3946_v14 = vld [vmem:[#allocation5 + $0x440] ss:$8 sps:$4 sm:$0xff]  }
 0x238   :  { %1154 = vmatpush1.bf16.msra.mxu0 %v3886_v19  ;;  %v3957_v19 = vld [vmem:[#allocation5 + $0x474] ss:$8 sps:$4 sm:$0xff]  }
 0x239   :  { %1155 = vmatprep.subr.bf16.mxu0 %v3891_v21  ;;  %v3960_v21 = vld [vmem:[#allocation5 + $0x484] ss:$8 sps:$4 sm:$0xff]  }
 0x23c   :  { %1156 = vmatpush1.bf16.msra.mxu0 %v3889_v22  ;;  %v3958_v22 = vld [vmem:[#allocation5 + $0x480] ss:$8 sps:$4 sm:$0xff]  }
 0x23d   :  { %1157 = vmatprep.subr.bf16.mxu0 %v3894_v23  ;;  %v3963_v23 = vld [vmem:[#allocation5 + $0x494] ss:$8 sps:$4 sm:$0xff]  }
 0x240   :  { %1158 = vmatpush1.bf16.msra.mxu0 %v3892_v24  ;;  %v3961_v24 = vld [vmem:[#allocation5 + $0x490] ss:$8 sps:$4 sm:$0xff]  }
 0x241   :  { %1159 = vmatprep.subr.bf16.mxu0 %v3897_v25  ;;  %v3966_v25 = vld [vmem:[#allocation5 + $0x4a4] ss:$8 sps:$4 sm:$0xff]  }
 0x244   :  { %1160 = vmatpush1.bf16.msra.mxu0 %v3895_v26  ;;  %v3964_v26 = vld [vmem:[#allocation5 + $0x4a0] ss:$8 sps:$4 sm:$0xff]  }
 0x245   :  { %1161 = vmatprep.subr.bf16.mxu0 %v3900_v29  ;;  %v3969_v29 = vld [vmem:[#allocation5 + $0x4b4] ss:$8 sps:$4 sm:$0xff]  }
 0x248   :  { %1162 = vmatpush1.bf16.msra.mxu0 %v3898_v30  ;;  %v3967_v30 = vld [vmem:[#allocation5 + $0x4b0] ss:$8 sps:$4 sm:$0xff]  }
 0x249   :  { %1163 = vmatprep.subr.bf16.mxu0 %v3903_v31  ;;  %v3972_v31 = vld [vmem:[#allocation5 + $0x4c4] ss:$8 sps:$4 sm:$0xff]  }
 0x24c   :  { %1164 = vmatpush1.bf16.msra.mxu0 %v3901_v32  ;;  %v3970_v32 = vld [vmem:[#allocation5 + $0x4c0] ss:$8 sps:$4 sm:$0xff]  }
 0x24d   :  { %1165 = vmatprep.subr.bf16.mxu0 %v3906_v33  ;;  %v3975_v33 = vld [vmem:[#allocation5 + $0x4d4] ss:$8 sps:$4 sm:$0xff]  }
 0x250   :  { %1166 = vmatpush1.bf16.msra.mxu0 %v3904_v34  ;;  %v3973_v34 = vld [vmem:[#allocation5 + $0x4d0] ss:$8 sps:$4 sm:$0xff]  }
 0x251   :  { %1167 = vmatprep.subr.bf16.mxu0 %v3909_v35  ;;  %v730_v35 = vld [vmem:[#allocation8 + $0x6] sm:$0x3] }
 0x254   :  { %1168 = vmatpush1.bf16.msra.mxu0 %v3907_v36  ;;  %v735_v36 = vrot.slane %v730_v35, %v4593_v8 }
 0x255   :  { %1169 = vmatprep.subr.bf16.mxu0 %v3912_v37  ;;  %v739_v37 = vrot.slane %v730_v35, %v4595_v10  ;;  %v4027_v35 = vld [vmem:[#allocation5 + $0x5f0] ss:$8 sps:$4 sm:$0xff]  }
 0x258   :  { %1170 = vmatpush1.bf16.msra.mxu0 %v3910_v38 }
 0x259   :  { %1171 = vmatprep.subr.bf16.mxu0 %v3915_v39 }
 0x25c   :  { %1172 = vmatpush1.bf16.msra.mxu0 %v3913_v40 }
 0x25d   :  { %1173 = vmatprep.subr.bf16.mxu0 %v3918_v41 }
 0x260   :  { %1174 = vmatpush1.bf16.msra.mxu0 %v3916_v42 }
 0x261   :  { %1175 = vmatprep.subr.bf16.mxu0 %v3921_v43 }
 0x264   :  { %1176 = vmatpush1.bf16.msra.mxu0 %v3919_v44 }
 0x265   :  { %1177 = vmatprep.subr.bf16.mxu0 %v3924_v45 }
 0x268   :  { %1178 = vmatpush1.bf16.msra.mxu0 %v3922_v46 }
 0x269   :  { %1179 = vmatprep.subr.bf16.mxu0 %v3927_v47 }
 0x26c   :  { %1180 = vmatpush1.bf16.msra.mxu0 %v3925_v48  ;;  %v3978_v48 = vld [vmem:[#allocation5 + $0x4e4] ss:$8 sps:$4 sm:$0xff]  }
 0x26d   :  { %1181 = vmatprep.subr.bf16.mxu0 %v3930_v62  ;;  %v4002_v62 = vld [vmem:[#allocation5 + $0x564] ss:$8 sps:$4 sm:$0xff]  }
 0x270   :  { %1182 = vmatpush1.bf16.msra.mxu0 %v3928_v63  ;;  %v4000_v63 = vld [vmem:[#allocation5 + $0x560] ss:$8 sps:$4 sm:$0xff]  }
 0x271   :  { %1183 = vmatprep.subr.bf16.mxu0 %v3933_v0  ;;  %v4005_v0 = vld [vmem:[#allocation5 + $0x574] ss:$8 sps:$4 sm:$0xff]  }
 0x274   :  { %1184 = vmatpush1.bf16.msra.mxu0 %v3931_v2  ;;  %v4003_v2 = vld [vmem:[#allocation5 + $0x570] ss:$8 sps:$4 sm:$0xff]  }
 0x30a   :  { %v685_v52 = vpop.f32.mrb[0].mxu0 }
 0x30b   :  { %v686_v53 = vadd.f32 %v685_v52, %v484_v50  ;;  %v687_v54 = vpop.f32.mrb[1].mxu0  ;;  %v3981_v50 = vld [vmem:[#allocation5 + $0x4f4] ss:$8 sps:$4 sm:$0xff]   ;;  %v3984_v52 = vld [vmem:[#allocation5 + $0x504] ss:$8 sps:$4 sm:$0xff]  }
 0x30c   :  { %v688_v55 = vadd.f32 %v687_v54, %v488_v51  ;;  %v689_v56 = vpop.f32.mrb[2].mxu0  ;;  %v3979_v51 = vld [vmem:[#allocation5 + $0x4f0] ss:$8 sps:$4 sm:$0xff]   ;;  %1655 = vmatprep.subr.bf16.mxu0 %v3984_v52  ;;  %v3990_v54 = vld [vmem:[#allocation5 + $0x524] ss:$8 sps:$4 sm:$0xff]  }
 0x30d   :  { %v692_v57 = vmax.f32 %v686_v53, 0.0  ;;  %v690_v58 = vpop.f32.mrb[3].mxu0  ;;  %v3985_v53 = vld [vmem:[#allocation5 + $0x510] ss:$8 sps:$4 sm:$0xff]   ;;  %v3993_v56 = vld [vmem:[#allocation5 + $0x534] ss:$8 sps:$4 sm:$0xff]  }
 0x30e   :  { %v693_v59 = vmax.f32 %v688_v55, 0.0  ;;  %v3988_v55 = vld [vmem:[#allocation5 + $0x520] ss:$8 sps:$4 sm:$0xff]   ;;  %v3996_v58 = vld [vmem:[#allocation5 + $0x544] ss:$8 sps:$4 sm:$0xff]  }
 0x30f   :  { %v727_v61 = vpack.c.bf16 %v692_v57, %v692_v57  ;;  %v3991_v57 = vld [vmem:[#allocation5 + $0x530] ss:$8 sps:$4 sm:$0xff]  }
 0x310   :  { %v728_v60 = vpack.c.bf16 %v693_v59, %v693_v59  ;;  %v3994_v59 = vld [vmem:[#allocation5 + $0x540] ss:$8 sps:$4 sm:$0xff]   ;;  %v4051_v52 = vld [vmem:[#allocation5 + $0x670] ss:$8 sps:$4 sm:$0xff]  }
 0x312   :  { %934 = vmatprep.mubr.bf16.mxu1 %v728_v60  ;;  %v3999_v60 = vld [vmem:[#allocation5 + $0x554] ss:$8 sps:$4 sm:$0xff]  }
 0x313   :  { %935 = vmatmul.mubr.bf16.vlgmr.msra.gmra.mrb[8].mxu1 %v727_v61  ;;  %v3997_v61 = vld [vmem:[#allocation5 + $0x550] ss:$8 sps:$4 sm:$0xff]  }
 0x314   :  { %1405 = vmatpush1.bf16.msra.mxu1 %v3934_v3  ;;  %v4008_v3 = vld [vmem:[#allocation5 + $0x584] ss:$8 sps:$4 sm:$0xff]  }
 0x315   :  { %1406 = vmatprep.subr.bf16.mxu1 %v3939_v5  ;;  %v4011_v5 = vld [vmem:[#allocation5 + $0x594] ss:$8 sps:$4 sm:$0xff]  }
 0x318   :  { %1407 = vmatpush1.bf16.msra.mxu1 %v3937_v6  ;;  %v4009_v6 = vld [vmem:[#allocation5 + $0x590] ss:$8 sps:$4 sm:$0xff]  }
 0x319   :  { %1408 = vmatprep.subr.bf16.mxu1 %v3942_v7  ;;  %v4014_v7 = vld [vmem:[#allocation5 + $0x5a4] ss:$8 sps:$4 sm:$0xff]  }
 0x31c   :  { %1409 = vmatpush1.bf16.msra.mxu1 %v3940_v9  ;;  %v4012_v9 = vld [vmem:[#allocation5 + $0x5a0] ss:$8 sps:$4 sm:$0xff]  }
 0x31d   :  { %1410 = vmatprep.subr.bf16.mxu1 %v3945_v11  ;;  %v4017_v11 = vld [vmem:[#allocation5 + $0x5b4] ss:$8 sps:$4 sm:$0xff]  }
 0x320   :  { %1411 = vmatpush1.bf16.msra.mxu1 %v3943_v12  ;;  %v4015_v12 = vld [vmem:[#allocation5 + $0x5b0] ss:$8 sps:$4 sm:$0xff]  }
 0x321   :  { %1412 = vmatprep.subr.bf16.mxu1 %v3948_v13  ;;  %v4020_v13 = vld [vmem:[#allocation5 + $0x5c4] ss:$8 sps:$4 sm:$0xff]  }
 0x324   :  { %1413 = vmatpush1.bf16.msra.mxu1 %v3946_v14  ;;  %v4018_v14 = vld [vmem:[#allocation5 + $0x5c0] ss:$8 sps:$4 sm:$0xff]  }
 0x325   :  { %1414 = vmatprep.subr.bf16.mxu1 %v3951_v15  ;;  %v4023_v15 = vld [vmem:[#allocation5 + $0x5d4] ss:$8 sps:$4 sm:$0xff]  }
 0x328   :  { %1415 = vmatpush1.bf16.msra.mxu1 %v3949_v16  ;;  %v4021_v16 = vld [vmem:[#allocation5 + $0x5d0] ss:$8 sps:$4 sm:$0xff]  }
 0x329   :  { %1416 = vmatprep.subr.bf16.mxu1 %v3954_v17  ;;  %v981_v17 = vld [vmem:[#allocation8 + $0x8] sm:$0x3] }
 0x32c   :  { %1417 = vmatpush1.bf16.msra.mxu1 %v3952_v18  ;;  %v986_v18 = vrot.slane %v981_v17, %v4593_v8 }
 0x32d   :  { %1418 = vmatprep.subr.bf16.mxu1 %v3957_v19  ;;  %v990_v19 = vrot.slane %v981_v17, %v4595_v10  ;;  %v4072_v17 = vld [vmem:[#allocation5 + $0x6e0] ss:$8 sps:$4 sm:$0xff]  }
 0x330   :  { %1419 = vmatpush1.bf16.msra.mxu1 %v3955_v20 }
 0x331   :  { %1420 = vmatprep.subr.bf16.mxu1 %v3960_v21 }
 0x334   :  { %1421 = vmatpush1.bf16.msra.mxu1 %v3958_v22 }
 0x335   :  { %1422 = vmatprep.subr.bf16.mxu1 %v3963_v23 }
 0x338   :  { %1423 = vmatpush1.bf16.msra.mxu1 %v3961_v24 }
 0x339   :  { %1424 = vmatprep.subr.bf16.mxu1 %v3966_v25 }
 0x33c   :  { %1425 = vmatpush1.bf16.msra.mxu1 %v3964_v26 }
 0x33d   :  { %1426 = vmatprep.subr.bf16.mxu1 %v3969_v29 }
 0x340   :  { %1427 = vmatpush1.bf16.msra.mxu1 %v3967_v30 }
 0x341   :  { %1428 = vmatprep.subr.bf16.mxu1 %v3972_v31 }
 0x344   :  { %1429 = vmatpush1.bf16.msra.mxu1 %v3970_v32  ;;  %v4026_v32 = vld [vmem:[#allocation5 + $0x5e4] ss:$8 sps:$4 sm:$0xff]  }
 0x345   :  { %1430 = vmatprep.subr.bf16.mxu1 %v3975_v33  ;;  %v4024_v33 = vld [vmem:[#allocation5 + $0x5e0] ss:$8 sps:$4 sm:$0xff]  }
 0x348   :  { %1431 = vmatpush1.bf16.msra.mxu1 %v3973_v34  ;;  %v4029_v34 = vld [vmem:[#allocation5 + $0x5f4] ss:$8 sps:$4 sm:$0xff]  }
 0x349   :  { %1432 = vmatprep.subr.bf16.mxu1 %v3978_v48  ;;  %v4047_v48 = vld [vmem:[#allocation5 + $0x654] ss:$8 sps:$4 sm:$0xff]  }
 0x34c   :  { %1433 = vmatpush1.bf16.msra.mxu1 %v3976_v49  ;;  %v4045_v49 = vld [vmem:[#allocation5 + $0x650] ss:$8 sps:$4 sm:$0xff]  }
 0x34d   :  { %1434 = vmatprep.subr.bf16.mxu1 %v3981_v50  ;;  %v4050_v50 = vld [vmem:[#allocation5 + $0x664] ss:$8 sps:$4 sm:$0xff]  }
 0x350   :  { %1435 = vmatpush1.bf16.msra.mxu1 %v3979_v51  ;;  %v4048_v51 = vld [vmem:[#allocation5 + $0x660] ss:$8 sps:$4 sm:$0xff]  }
 0x3e6   :  { %v936_v38 = vpop.f32.mrb[8].mxu1 }
 0x3e7   :  { %v937_v39 = vadd.f32 %v936_v38, %v735_v36  ;;  %v938_v40 = vpop.f32.mrb[9].mxu1  ;;  %v4030_v36 = vld [vmem:[#allocation5 + $0x600] ss:$8 sps:$4 sm:$0xff]   ;;  %v4035_v38 = vld [vmem:[#allocation5 + $0x614] ss:$8 sps:$4 sm:$0xff]  }
 0x3e8   :  { %v939_v41 = vadd.f32 %v938_v40, %v739_v37  ;;  %v940_v42 = vpop.f32.mrb[10].mxu1  ;;  %v4032_v37 = vld [vmem:[#allocation5 + $0x604] ss:$8 sps:$4 sm:$0xff]  }
 0x3e9   :  { %v4614_v43 = vadd.f32 %v937_v39, %v4599_v27  ;;  %v941_v44 = vpop.f32.mrb[11].mxu1  ;;  %v3982_v27 = vld [vmem:[#allocation5 + $0x500] ss:$8 sps:$4 sm:$0xff]   ;;  %1906 = vmatprep.subr.bf16.mxu1 %v4032_v37  ;;  %v4033_v39 = vld [vmem:[#allocation5 + $0x610] ss:$8 sps:$4 sm:$0xff]  }
 0x3ea   :  { %v4617_v45 = vadd.f32 %v939_v41, %v4601_v28  ;;  %v3987_v28 = vld [vmem:[#allocation5 + $0x514] ss:$8 sps:$4 sm:$0xff]   ;;  %v4038_v40 = vld [vmem:[#allocation5 + $0x624] ss:$8 sps:$4 sm:$0xff]   ;;  %v4036_v41 = vld [vmem:[#allocation5 + $0x620] ss:$8 sps:$4 sm:$0xff]  }
 0x3eb   :  { %v978_v47 = vpack.c.bf16 %v4614_v43, %v4614_v43  ;;  %v4041_v42 = vld [vmem:[#allocation5 + $0x634] ss:$8 sps:$4 sm:$0xff]   ;;  %v4039_v44 = vld [vmem:[#allocation5 + $0x630] ss:$8 sps:$4 sm:$0xff]  }
 0x3ec   :  { %v979_v46 = vpack.c.bf16 %v4617_v45, %v4617_v45  ;;  %v4099_v37 = vld [vmem:[#allocation5 + $0x770] ss:$8 sps:$4 sm:$0xff]  }
 0x3ee   :  { %1185 = vmatprep.mubr.bf16.mxu0 %v979_v46  ;;  %v4044_v46 = vld [vmem:[#allocation5 + $0x644] ss:$8 sps:$4 sm:$0xff]  }
 0x3ef   :  { %1186 = vmatmul.mubr.bf16.vlgmr.msra.gmra.mrb[4].mxu0 %v978_v47  ;;  %v4042_v47 = vld [vmem:[#allocation5 + $0x640] ss:$8 sps:$4 sm:$0xff]  }
 0x3f0   :  { %1656 = vmatpush1.bf16.msra.mxu0 %v3982_v27  ;;  %v4053_v27 = vld [vmem:[#allocation5 + $0x674] ss:$8 sps:$4 sm:$0xff]  }
 0x3f1   :  { %1657 = vmatprep.subr.bf16.mxu0 %v3987_v28  ;;  %v4056_v28 = vld [vmem:[#allocation5 + $0x684] ss:$8 sps:$4 sm:$0xff]  }
 0x3f4   :  { %1658 = vmatpush1.bf16.msra.mxu0 %v3985_v53  ;;  %v4054_v53 = vld [vmem:[#allocation5 + $0x680] ss:$8 sps:$4 sm:$0xff]  }
 0x3f5   :  { %1659 = vmatprep.subr.bf16.mxu0 %v3990_v54  ;;  %v4059_v54 = vld [vmem:[#allocation5 + $0x694] ss:$8 sps:$4 sm:$0xff]  }
 0x3f8   :  { %1660 = vmatpush1.bf16.msra.mxu0 %v3988_v55  ;;  %v4057_v55 = vld [vmem:[#allocation5 + $0x690] ss:$8 sps:$4 sm:$0xff]  }
 0x3f9   :  { %1661 = vmatprep.subr.bf16.mxu0 %v3993_v56  ;;  %v4062_v56 = vld [vmem:[#allocation5 + $0x6a4] ss:$8 sps:$4 sm:$0xff]  }
 0x3fc   :  { %1662 = vmatpush1.bf16.msra.mxu0 %v3991_v57  ;;  %v4060_v57 = vld [vmem:[#allocation5 + $0x6a0] ss:$8 sps:$4 sm:$0xff]  }
 0x3fd   :  { %1663 = vmatprep.subr.bf16.mxu0 %v3996_v58  ;;  %v4065_v58 = vld [vmem:[#allocation5 + $0x6b4] ss:$8 sps:$4 sm:$0xff]  }
 0x400   :  { %1664 = vmatpush1.bf16.msra.mxu0 %v3994_v59  ;;  %v4063_v59 = vld [vmem:[#allocation5 + $0x6b0] ss:$8 sps:$4 sm:$0xff]  }
 0x401   :  { %1665 = vmatprep.subr.bf16.mxu0 %v3999_v60  ;;  %v4068_v60 = vld [vmem:[#allocation5 + $0x6c4] ss:$8 sps:$4 sm:$0xff]  }
 0x404   :  { %1666 = vmatpush1.bf16.msra.mxu0 %v3997_v61  ;;  %v4066_v61 = vld [vmem:[#allocation5 + $0x6c0] ss:$8 sps:$4 sm:$0xff]  }
 0x405   :  { %1667 = vmatprep.subr.bf16.mxu0 %v4002_v62  ;;  %v4071_v62 = vld [vmem:[#allocation5 + $0x6d4] ss:$8 sps:$4 sm:$0xff]  }
 0x408   :  { %1668 = vmatpush1.bf16.msra.mxu0 %v4000_v63  ;;  %v4069_v63 = vld [vmem:[#allocation5 + $0x6d0] ss:$8 sps:$4 sm:$0xff]  }
 0x409   :  { %1669 = vmatprep.subr.bf16.mxu0 %v4005_v0  ;;  %v1232_v0 = vld [vmem:[#allocation8 + $0xa] sm:$0x3] }
 0x40c   :  { %1670 = vmatpush1.bf16.msra.mxu0 %v4003_v2  ;;  %v1237_v2 = vrot.slane %v1232_v0, %v4593_v8 }
 0x40d   :  { %1671 = vmatprep.subr.bf16.mxu0 %v4008_v3  ;;  %v1241_v3 = vrot.slane %v1232_v0, %v4595_v10  ;;  %v4120_v0 = vld [vmem:[#allocation5 + $0x7e0] ss:$8 sps:$4 sm:$0xff]  }
 0x410   :  { %1672 = vmatpush1.bf16.msra.mxu0 %v4006_v4 }
 0x411   :  { %1673 = vmatprep.subr.bf16.mxu0 %v4011_v5 }
 0x414   :  { %1674 = vmatpush1.bf16.msra.mxu0 %v4009_v6 }
 0x415   :  { %1675 = vmatprep.subr.bf16.mxu0 %v4014_v7 }
 0x418   :  { %1676 = vmatpush1.bf16.msra.mxu0 %v4012_v9 }
 0x419   :  { %1677 = vmatprep.subr.bf16.mxu0 %v4017_v11 }
 0x41c   :  { %1678 = vmatpush1.bf16.msra.mxu0 %v4015_v12 }
 0x41d   :  { %1679 = vmatprep.subr.bf16.mxu0 %v4020_v13 }
 0x420   :  { %1680 = vmatpush1.bf16.msra.mxu0 %v4018_v14 }
 0x421   :  { %1681 = vmatprep.subr.bf16.mxu0 %v4023_v15 }
 0x424   :  { %1682 = vmatpush1.bf16.msra.mxu0 %v4021_v16  ;;  %v4074_v16 = vld [vmem:[#allocation5 + $0x6e4] ss:$8 sps:$4 sm:$0xff]  }
 0x425   :  { %1683 = vmatprep.subr.bf16.mxu0 %v4026_v32  ;;  %v4095_v32 = vld [vmem:[#allocation5 + $0x754] ss:$8 sps:$4 sm:$0xff]  }
 0x428   :  { %1684 = vmatpush1.bf16.msra.mxu0 %v4024_v33  ;;  %v4093_v33 = vld [vmem:[#allocation5 + $0x750] ss:$8 sps:$4 sm:$0xff]  }
 0x429   :  { %1685 = vmatprep.subr.bf16.mxu0 %v4029_v34  ;;  %v4098_v34 = vld [vmem:[#allocation5 + $0x764] ss:$8 sps:$4 sm:$0xff]  }
 0x42c   :  { %1686 = vmatpush1.bf16.msra.mxu0 %v4027_v35  ;;  %v4096_v35 = vld [vmem:[#allocation5 + $0x760] ss:$8 sps:$4 sm:$0xff]  }
 0x4c2   :  { %v1187_v20 = vpop.f32.mrb[4].mxu0 }
 0x4c3   :  { %v1188_v21 = vadd.f32 %v1187_v20, %v986_v18  ;;  %v1189_v22 = vpop.f32.mrb[5].mxu0  ;;  %v4077_v18 = vld [vmem:[#allocation5 + $0x6f4] ss:$8 sps:$4 sm:$0xff]   ;;  %v4078_v20 = vld [vmem:[#allocation5 + $0x700] ss:$8 sps:$4 sm:$0xff]  }
 0x4c4   :  { %v1190_v23 = vadd.f32 %v1189_v22, %v990_v19  ;;  %v1191_v24 = vpop.f32.mrb[6].mxu0  ;;  %v4075_v19 = vld [vmem:[#allocation5 + $0x6f0] ss:$8 sps:$4 sm:$0xff]   ;;  %v4083_v22 = vld [vmem:[#allocation5 + $0x714] ss:$8 sps:$4 sm:$0xff]  }
 0x4c5   :  { %v1194_v25 = vmax.f32 %v1188_v21, 0.0  ;;  %v1192_v26 = vpop.f32.mrb[7].mxu0  ;;  %v4080_v21 = vld [vmem:[#allocation5 + $0x704] ss:$8 sps:$4 sm:$0xff]  }
 0x4c6   :  { %v1195_v29 = vmax.f32 %v1190_v23, 0.0  ;;  %2157 = vmatprep.subr.bf16.mxu0 %v4080_v21  ;;  %v4081_v23 = vld [vmem:[#allocation5 + $0x710] ss:$8 sps:$4 sm:$0xff]   ;;  %v4086_v24 = vld [vmem:[#allocation5 + $0x724] ss:$8 sps:$4 sm:$0xff]  }
 0x4c7   :  { %v1229_v31 = vpack.c.bf16 %v1194_v25, %v1194_v25  ;;  %v4084_v25 = vld [vmem:[#allocation5 + $0x720] ss:$8 sps:$4 sm:$0xff]   ;;  %v4089_v26 = vld [vmem:[#allocation5 + $0x734] ss:$8 sps:$4 sm:$0xff]  }
 0x4c8   :  { %v1230_v30 = vpack.c.bf16 %v1195_v29, %v1195_v29  ;;  %v4087_v29 = vld [vmem:[#allocation5 + $0x730] ss:$8 sps:$4 sm:$0xff]   ;;  %v4150_v21 = vld [vmem:[#allocation5 + $0x880] ss:$8 sps:$4 sm:$0xff]  }
 0x4ca   :  { %1436 = vmatprep.mubr.bf16.mxu1 %v1230_v30  ;;  %v4092_v30 = vld [vmem:[#allocation5 + $0x744] ss:$8 sps:$4 sm:$0xff]  }
 0x4cb   :  { %1437 = vmatmul.mubr.bf16.vlgmr.msra.gmra.mrb[12].mxu1 %v1229_v31  ;;  %v4090_v31 = vld [vmem:[#allocation5 + $0x740] ss:$8 sps:$4 sm:$0xff]  }
 0x4cc   :  { %1907 = vmatpush1.bf16.msra.mxu1 %v4030_v36  ;;  %v4101_v36 = vld [vmem:[#allocation5 + $0x774] ss:$8 sps:$4 sm:$0xff]  }
 0x4cd   :  { %1908 = vmatprep.subr.bf16.mxu1 %v4035_v38  ;;  %v4104_v38 = vld [vmem:[#allocation5 + $0x784] ss:$8 sps:$4 sm:$0xff]  }
 0x4d0   :  { %1909 = vmatpush1.bf16.msra.mxu1 %v4033_v39  ;;  %v4102_v39 = vld [vmem:[#allocation5 + $0x780] ss:$8 sps:$4 sm:$0xff]  }
 0x4d1   :  { %1910 = vmatprep.subr.bf16.mxu1 %v4038_v40  ;;  %v4107_v40 = vld [vmem:[#allocation5 + $0x794] ss:$8 sps:$4 sm:$0xff]  }
 0x4d4   :  { %1911 = vmatpush1.bf16.msra.mxu1 %v4036_v41  ;;  %v4105_v41 = vld [vmem:[#allocation5 + $0x790] ss:$8 sps:$4 sm:$0xff]  }
 0x4d5   :  { %1912 = vmatprep.subr.bf16.mxu1 %v4041_v42  ;;  %v4110_v42 = vld [vmem:[#allocation5 + $0x7a4] ss:$8 sps:$4 sm:$0xff]  }
 0x4d8   :  { %1913 = vmatpush1.bf16.msra.mxu1 %v4039_v44  ;;  %v4108_v44 = vld [vmem:[#allocation5 + $0x7a0] ss:$8 sps:$4 sm:$0xff]  }
 0x4d9   :  { %1914 = vmatprep.subr.bf16.mxu1 %v4044_v46  ;;  %v4113_v46 = vld [vmem:[#allocation5 + $0x7b4] ss:$8 sps:$4 sm:$0xff]  }
 0x4dc   :  { %1915 = vmatpush1.bf16.msra.mxu1 %v4042_v47  ;;  %v4111_v47 = vld [vmem:[#allocation5 + $0x7b0] ss:$8 sps:$4 sm:$0xff]  }
 0x4dd   :  { %1916 = vmatprep.subr.bf16.mxu1 %v4047_v48  ;;  %v4116_v48 = vld [vmem:[#allocation5 + $0x7c4] ss:$8 sps:$4 sm:$0xff]  }
 0x4e0   :  { %1917 = vmatpush1.bf16.msra.mxu1 %v4045_v49  ;;  %v4114_v49 = vld [vmem:[#allocation5 + $0x7c0] ss:$8 sps:$4 sm:$0xff]  }
 0x4e1   :  { %1918 = vmatprep.subr.bf16.mxu1 %v4050_v50  ;;  %v4119_v50 = vld [vmem:[#allocation5 + $0x7d4] ss:$8 sps:$4 sm:$0xff]  }
 0x4e4   :  { %1919 = vmatpush1.bf16.msra.mxu1 %v4048_v51  ;;  %v4117_v51 = vld [vmem:[#allocation5 + $0x7d0] ss:$8 sps:$4 sm:$0xff]  }
 0x4e5   :  { %1920 = vmatprep.subr.bf16.mxu1 %v4053_v27  ;;  %v1483_v27 = vld [vmem:[#allocation8 + $0xc] sm:$0x3] }
 0x4e8   :  { %1921 = vmatpush1.bf16.msra.mxu1 %v4051_v52  ;;  %v1488_v52 = vrot.slane %v1483_v27, %v4593_v8 }
 0x4e9   :  { %1922 = vmatprep.subr.bf16.mxu1 %v4056_v28  ;;  %v1492_v28 = vrot.slane %v1483_v27, %v4595_v10  ;;  %v4171_v27 = vld [vmem:[#allocation5 + $0x8f0] ss:$8 sps:$4 sm:$0xff]  }
 0x4ec   :  { %1923 = vmatpush1.bf16.msra.mxu1 %v4054_v53 }
 0x4ed   :  { %1924 = vmatprep.subr.bf16.mxu1 %v4059_v54 }
 0x4f0   :  { %1925 = vmatpush1.bf16.msra.mxu1 %v4057_v55 }
 0x4f1   :  { %1926 = vmatprep.subr.bf16.mxu1 %v4062_v56 }
 0x4f4   :  { %1927 = vmatpush1.bf16.msra.mxu1 %v4060_v57 }
 0x4f5   :  { %1928 = vmatprep.subr.bf16.mxu1 %v4065_v58 }
 0x4f8   :  { %1929 = vmatpush1.bf16.msra.mxu1 %v4063_v59 }
 0x4f9   :  { %1930 = vmatprep.subr.bf16.mxu1 %v4068_v60 }
 0x4fc   :  { %1931 = vmatpush1.bf16.msra.mxu1 %v4066_v61 }
 0x4fd   :  { %1932 = vmatprep.subr.bf16.mxu1 %v4071_v62 }
 0x500   :  { %1933 = vmatpush1.bf16.msra.mxu1 %v4069_v63  ;;  %v4122_v63 = vld [vmem:[#allocation5 + $0x7e4] ss:$8 sps:$4 sm:$0xff]  }
 0x501   :  { %1934 = vmatprep.subr.bf16.mxu1 %v4074_v16  ;;  %v4146_v16 = vld [vmem:[#allocation5 + $0x864] ss:$8 sps:$4 sm:$0xff]  }
 0x504   :  { %1935 = vmatpush1.bf16.msra.mxu1 %v4072_v17  ;;  %v4144_v17 = vld [vmem:[#allocation5 + $0x860] ss:$8 sps:$4 sm:$0xff]  }
 0x505   :  { %1936 = vmatprep.subr.bf16.mxu1 %v4077_v18  ;;  %v4149_v18 = vld [vmem:[#allocation5 + $0x874] ss:$8 sps:$4 sm:$0xff]  }
 0x508   :  { %1937 = vmatpush1.bf16.msra.mxu1 %v4075_v19  ;;  %v4147_v19 = vld [vmem:[#allocation5 + $0x870] ss:$8 sps:$4 sm:$0xff]  }
 0x59e   :  { %v1438_v4 = vpop.f32.mrb[12].mxu1 }
 0x59f   :  { %v1439_v5 = vadd.f32 %v1438_v4, %v1237_v2  ;;  %v1440_v6 = vpop.f32.mrb[13].mxu1  ;;  %v4125_v2 = vld [vmem:[#allocation5 + $0x7f4] ss:$8 sps:$4 sm:$0xff]   ;;  %v4128_v4 = vld [vmem:[#allocation5 + $0x804] ss:$8 sps:$4 sm:$0xff]  }
 0x5a0   :  { %v1441_v7 = vadd.f32 %v1440_v6, %v1241_v3  ;;  %v1442_v9 = vpop.f32.mrb[14].mxu1  ;;  %v4123_v3 = vld [vmem:[#allocation5 + $0x7f0] ss:$8 sps:$4 sm:$0xff]   ;;  %2408 = vmatprep.subr.bf16.mxu1 %v4128_v4  ;;  %v4134_v6 = vld [vmem:[#allocation5 + $0x824] ss:$8 sps:$4 sm:$0xff]  }
 0x5a1   :  { %v1445_v11 = vmax.f32 %v1439_v5, 0.0  ;;  %v1443_v12 = vpop.f32.mrb[15].mxu1  ;;  %v4129_v5 = vld [vmem:[#allocation5 + $0x810] ss:$8 sps:$4 sm:$0xff]   ;;  %v4137_v9 = vld [vmem:[#allocation5 + $0x834] ss:$8 sps:$4 sm:$0xff]  }
 0x5a2   :  { %v1446_v13 = vmax.f32 %v1441_v7, 0.0  ;;  %v4132_v7 = vld [vmem:[#allocation5 + $0x820] ss:$8 sps:$4 sm:$0xff]   ;;  %v4140_v12 = vld [vmem:[#allocation5 + $0x844] ss:$8 sps:$4 sm:$0xff]  }
 0x5a3   :  { %v1480_v15 = vpack.c.bf16 %v1445_v11, %v1445_v11  ;;  %v4135_v11 = vld [vmem:[#allocation5 + $0x830] ss:$8 sps:$4 sm:$0xff]  }
 0x5a4   :  { %v1481_v14 = vpack.c.bf16 %v1446_v13, %v1446_v13  ;;  %v4138_v13 = vld [vmem:[#allocation5 + $0x840] ss:$8 sps:$4 sm:$0xff]   ;;  %v4195_v4 = vld [vmem:[#allocation5 + $0x970] ss:$8 sps:$4 sm:$0xff]  }
 0x5a6   :  { %1687 = vmatprep.mubr.bf16.mxu0 %v1481_v14  ;;  %v4143_v14 = vld [vmem:[#allocation5 + $0x854] ss:$8 sps:$4 sm:$0xff]  }
 0x5a7   :  { %1688 = vmatmul.mubr.bf16.vlgmr.msra.gmra.mrb[8].mxu0 %v1480_v15  ;;  %v4141_v15 = vld [vmem:[#allocation5 + $0x850] ss:$8 sps:$4 sm:$0xff]  }
 0x5a8   :  { %2158 = vmatpush1.bf16.msra.mxu0 %v4078_v20  ;;  %v4152_v20 = vld [vmem:[#allocation5 + $0x884] ss:$8 sps:$4 sm:$0xff]  }
 0x5a9   :  { %2159 = vmatprep.subr.bf16.mxu0 %v4083_v22  ;;  %v4155_v22 = vld [vmem:[#allocation5 + $0x894] ss:$8 sps:$4 sm:$0xff]  }
 0x5ac   :  { %2160 = vmatpush1.bf16.msra.mxu0 %v4081_v23  ;;  %v4153_v23 = vld [vmem:[#allocation5 + $0x890] ss:$8 sps:$4 sm:$0xff]  }
 0x5ad   :  { %2161 = vmatprep.subr.bf16.mxu0 %v4086_v24  ;;  %v4158_v24 = vld [vmem:[#allocation5 + $0x8a4] ss:$8 sps:$4 sm:$0xff]  }
 0x5b0   :  { %2162 = vmatpush1.bf16.msra.mxu0 %v4084_v25  ;;  %v4156_v25 = vld [vmem:[#allocation5 + $0x8a0] ss:$8 sps:$4 sm:$0xff]  }
 0x5b1   :  { %2163 = vmatprep.subr.bf16.mxu0 %v4089_v26  ;;  %v4161_v26 = vld [vmem:[#allocation5 + $0x8b4] ss:$8 sps:$4 sm:$0xff]  }
 0x5b4   :  { %2164 = vmatpush1.bf16.msra.mxu0 %v4087_v29  ;;  %v4159_v29 = vld [vmem:[#allocation5 + $0x8b0] ss:$8 sps:$4 sm:$0xff]  }
 0x5b5   :  { %2165 = vmatprep.subr.bf16.mxu0 %v4092_v30  ;;  %v4164_v30 = vld [vmem:[#allocation5 + $0x8c4] ss:$8 sps:$4 sm:$0xff]  }
 0x5b8   :  { %2166 = vmatpush1.bf16.msra.mxu0 %v4090_v31  ;;  %v4162_v31 = vld [vmem:[#allocation5 + $0x8c0] ss:$8 sps:$4 sm:$0xff]  }
 0x5b9   :  { %2167 = vmatprep.subr.bf16.mxu0 %v4095_v32  ;;  %v4167_v32 = vld [vmem:[#allocation5 + $0x8d4] ss:$8 sps:$4 sm:$0xff]  }
 0x5bc   :  { %2168 = vmatpush1.bf16.msra.mxu0 %v4093_v33  ;;  %v4165_v33 = vld [vmem:[#allocation5 + $0x8d0] ss:$8 sps:$4 sm:$0xff]  }
 0x5bd   :  { %2169 = vmatprep.subr.bf16.mxu0 %v4098_v34  ;;  %v1734_v34 = vld [vmem:[#allocation8 + $0xe] sm:$0x3] }
 0x5c0   :  { %2170 = vmatpush1.bf16.msra.mxu0 %v4096_v35  ;;  %v1739_v35 = vrot.slane %v1734_v34, %v4593_v8 }
 0x5c1   :  { %2171 = vmatprep.subr.bf16.mxu0 %v4101_v36  ;;  %v1743_v36 = vrot.slane %v1734_v34, %v4595_v10  ;;  %v4216_v34 = vld [vmem:[#allocation5 + $0x9e0] ss:$8 sps:$4 sm:$0xff]  }
 0x5c4   :  { %2172 = vmatpush1.bf16.msra.mxu0 %v4099_v37 }
 0x5c5   :  { %2173 = vmatprep.subr.bf16.mxu0 %v4104_v38 }
 0x5c8   :  { %2174 = vmatpush1.bf16.msra.mxu0 %v4102_v39 }
 0x5c9   :  { %2175 = vmatprep.subr.bf16.mxu0 %v4107_v40 }
 0x5cc   :  { %2176 = vmatpush1.bf16.msra.mxu0 %v4105_v41 }
 0x5cd   :  { %2177 = vmatprep.subr.bf16.mxu0 %v4110_v42 }
 0x5d0   :  { %2178 = vmatpush1.bf16.msra.mxu0 %v4108_v44 }
 0x5d1   :  { %2179 = vmatprep.subr.bf16.mxu0 %v4113_v46 }
 0x5d4   :  { %2180 = vmatpush1.bf16.msra.mxu0 %v4111_v47 }
 0x5d5   :  { %2181 = vmatprep.subr.bf16.mxu0 %v4116_v48 }
 0x5d8   :  { %2182 = vmatpush1.bf16.msra.mxu0 %v4114_v49  ;;  %v4170_v49 = vld [vmem:[#allocation5 + $0x8e4] ss:$8 sps:$4 sm:$0xff]  }
 0x5d9   :  { %2183 = vmatprep.subr.bf16.mxu0 %v4119_v50  ;;  %v4168_v50 = vld [vmem:[#allocation5 + $0x8e0] ss:$8 sps:$4 sm:$0xff]  }
 0x5dc   :  { %2184 = vmatpush1.bf16.msra.mxu0 %v4117_v51  ;;  %v4173_v51 = vld [vmem:[#allocation5 + $0x8f4] ss:$8 sps:$4 sm:$0xff]  }
 0x5dd   :  { %2185 = vmatprep.subr.bf16.mxu0 %v4122_v63  ;;  %v4191_v63 = vld [vmem:[#allocation5 + $0x954] ss:$8 sps:$4 sm:$0xff]  }
 0x5e0   :  { %2186 = vmatpush1.bf16.msra.mxu0 %v4120_v0  ;;  %v4189_v0 = vld [vmem:[#allocation5 + $0x950] ss:$8 sps:$4 sm:$0xff]  }
 0x5e1   :  { %2187 = vmatprep.subr.bf16.mxu0 %v4125_v2  ;;  %v4194_v2 = vld [vmem:[#allocation5 + $0x964] ss:$8 sps:$4 sm:$0xff]  }
 0x5e4   :  { %2188 = vmatpush1.bf16.msra.mxu0 %v4123_v3  ;;  %v4192_v3 = vld [vmem:[#allocation5 + $0x960] ss:$8 sps:$4 sm:$0xff]  }
 0x67a   :  { %v1689_v53 = vpop.f32.mrb[8].mxu0 }
 0x67b   :  { %v1690_v54 = vadd.f32 %v1689_v53, %v1488_v52  ;;  %v1691_v55 = vpop.f32.mrb[9].mxu0  ;;  %v4174_v52 = vld [vmem:[#allocation5 + $0x900] ss:$8 sps:$4 sm:$0xff]   ;;  %v4179_v53 = vld [vmem:[#allocation5 + $0x914] ss:$8 sps:$4 sm:$0xff]  }
 0x67c   :  { %v1692_v56 = vadd.f32 %v1691_v55, %v1492_v28  ;;  %v1693_v57 = vpop.f32.mrb[10].mxu0  ;;  %v4176_v28 = vld [vmem:[#allocation5 + $0x904] ss:$8 sps:$4 sm:$0xff]  }
 0x67d   :  { %v4630_v58 = vadd.f32 %v1690_v54, %v4614_v43  ;;  %v1694_v59 = vpop.f32.mrb[11].mxu0  ;;  %v4126_v43 = vld [vmem:[#allocation5 + $0x800] ss:$8 sps:$4 sm:$0xff]   ;;  %2659 = vmatprep.subr.bf16.mxu0 %v4176_v28  ;;  %v4177_v54 = vld [vmem:[#allocation5 + $0x910] ss:$8 sps:$4 sm:$0xff]  }
 0x67e   :  { %v4633_v60 = vadd.f32 %v1692_v56, %v4617_v45  ;;  %v4131_v45 = vld [vmem:[#allocation5 + $0x814] ss:$8 sps:$4 sm:$0xff]   ;;  %v4182_v55 = vld [vmem:[#allocation5 + $0x924] ss:$8 sps:$4 sm:$0xff]   ;;  %v4180_v56 = vld [vmem:[#allocation5 + $0x920] ss:$8 sps:$4 sm:$0xff]  }
 0x67f   :  { %v1731_v62 = vpack.c.bf16 %v4630_v58, %v4630_v58  ;;  %v4185_v57 = vld [vmem:[#allocation5 + $0x934] ss:$8 sps:$4 sm:$0xff]   ;;  %v4183_v59 = vld [vmem:[#allocation5 + $0x930] ss:$8 sps:$4 sm:$0xff]  }
 0x680   :  { %v1732_v61 = vpack.c.bf16 %v4633_v60, %v4633_v60  ;;  %v4243_v28 = vld [vmem:[#allocation5 + $0xa70] ss:$8 sps:$4 sm:$0xff]  }
 0x682   :  { %1938 = vmatprep.mubr.bf16.mxu1 %v1732_v61  ;;  %v4188_v61 = vld [vmem:[#allocation5 + $0x944] ss:$8 sps:$4 sm:$0xff]  }
 0x683   :  { %1939 = vmatmul.mubr.bf16.vlgmr.msra.gmra.mrb[16].mxu1 %v1731_v62  ;;  %v4186_v62 = vld [vmem:[#allocation5 + $0x940] ss:$8 sps:$4 sm:$0xff]  }
 0x684   :  { %2409 = vmatpush1.bf16.msra.mxu1 %v4126_v43  ;;  %v4197_v43 = vld [vmem:[#allocation5 + $0x974] ss:$8 sps:$4 sm:$0xff]  }
 0x685   :  { %2410 = vmatprep.subr.bf16.mxu1 %v4131_v45  ;;  %v4200_v45 = vld [vmem:[#allocation5 + $0x984] ss:$8 sps:$4 sm:$0xff]  }
 0x688   :  { %2411 = vmatpush1.bf16.msra.mxu1 %v4129_v5  ;;  %v4198_v5 = vld [vmem:[#allocation5 + $0x980] ss:$8 sps:$4 sm:$0xff]  }
 0x689   :  { %2412 = vmatprep.subr.bf16.mxu1 %v4134_v6  ;;  %v4203_v6 = vld [vmem:[#allocation5 + $0x994] ss:$8 sps:$4 sm:$0xff]  }
 0x68c   :  { %2413 = vmatpush1.bf16.msra.mxu1 %v4132_v7  ;;  %v4201_v7 = vld [vmem:[#allocation5 + $0x990] ss:$8 sps:$4 sm:$0xff]  }
 0x68d   :  { %2414 = vmatprep.subr.bf16.mxu1 %v4137_v9  ;;  %v4206_v9 = vld [vmem:[#allocation5 + $0x9a4] ss:$8 sps:$4 sm:$0xff]  }
 0x690   :  { %2415 = vmatpush1.bf16.msra.mxu1 %v4135_v11  ;;  %v4204_v11 = vld [vmem:[#allocation5 + $0x9a0] ss:$8 sps:$4 sm:$0xff]  }
 0x691   :  { %2416 = vmatprep.subr.bf16.mxu1 %v4140_v12  ;;  %v4209_v12 = vld [vmem:[#allocation5 + $0x9b4] ss:$8 sps:$4 sm:$0xff]  }
 0x694   :  { %2417 = vmatpush1.bf16.msra.mxu1 %v4138_v13  ;;  %v4207_v13 = vld [vmem:[#allocation5 + $0x9b0] ss:$8 sps:$4 sm:$0xff]  }
 0x695   :  { %2418 = vmatprep.subr.bf16.mxu1 %v4143_v14  ;;  %v4212_v14 = vld [vmem:[#allocation5 + $0x9c4] ss:$8 sps:$4 sm:$0xff]  }
 0x698   :  { %2419 = vmatpush1.bf16.msra.mxu1 %v4141_v15  ;;  %v4210_v15 = vld [vmem:[#allocation5 + $0x9c0] ss:$8 sps:$4 sm:$0xff]  }
 0x699   :  { %2420 = vmatprep.subr.bf16.mxu1 %v4146_v16  ;;  %v4215_v16 = vld [vmem:[#allocation5 + $0x9d4] ss:$8 sps:$4 sm:$0xff]  }
 0x69c   :  { %2421 = vmatpush1.bf16.msra.mxu1 %v4144_v17  ;;  %v4213_v17 = vld [vmem:[#allocation5 + $0x9d0] ss:$8 sps:$4 sm:$0xff]  }
 0x69d   :  { %2422 = vmatprep.subr.bf16.mxu1 %v4149_v18  ;;  %v1985_v18 = vld [vmem:[#allocation8 + $0x10] sm:$0x3] }
 0x6a0   :  { %2423 = vmatpush1.bf16.msra.mxu1 %v4147_v19  ;;  %v1990_v19 = vrot.slane %v1985_v18, %v4593_v8 }
 0x6a1   :  { %2424 = vmatprep.subr.bf16.mxu1 %v4152_v20  ;;  %v1994_v20 = vrot.slane %v1985_v18, %v4595_v10  ;;  %v3691_v18 = vld.sshfl [vmem:[#allocation7] sm:$0x33 pattern:$0x76325410] }
 0x6a4   :  { %2425 = vmatpush1.bf16.msra.mxu1 %v4150_v21 }
 0x6a5   :  { %2426 = vmatprep.subr.bf16.mxu1 %v4155_v22 }
 0x6a8   :  { %2427 = vmatpush1.bf16.msra.mxu1 %v4153_v23 }
 0x6a9   :  { %2428 = vmatprep.subr.bf16.mxu1 %v4158_v24 }
 0x6ac   :  { %2429 = vmatpush1.bf16.msra.mxu1 %v4156_v25 }
 0x6ad   :  { %2430 = vmatprep.subr.bf16.mxu1 %v4161_v26 }
 0x6b0   :  { %2431 = vmatpush1.bf16.msra.mxu1 %v4159_v29 }
 0x6b1   :  { %2432 = vmatprep.subr.bf16.mxu1 %v4164_v30 }
 0x6b4   :  { %2433 = vmatpush1.bf16.msra.mxu1 %v4162_v31 }
 0x6b5   :  { %2434 = vmatprep.subr.bf16.mxu1 %v4167_v32 }
 0x6b8   :  { %2435 = vmatpush1.bf16.msra.mxu1 %v4165_v33  ;;  %v4218_v33 = vld [vmem:[#allocation5 + $0x9e4] ss:$8 sps:$4 sm:$0xff]  }
 0x6b9   :  { %2436 = vmatprep.subr.bf16.mxu1 %v4170_v49  ;;  %v4239_v49 = vld [vmem:[#allocation5 + $0xa54] ss:$8 sps:$4 sm:$0xff]  }
 0x6bc   :  { %2437 = vmatpush1.bf16.msra.mxu1 %v4168_v50  ;;  %v4237_v50 = vld [vmem:[#allocation5 + $0xa50] ss:$8 sps:$4 sm:$0xff]  }
 0x6bd   :  { %2438 = vmatprep.subr.bf16.mxu1 %v4173_v51  ;;  %v4242_v51 = vld [vmem:[#allocation5 + $0xa64] ss:$8 sps:$4 sm:$0xff]  }
 0x6c0   :  { %2439 = vmatpush1.bf16.msra.mxu1 %v4171_v27  ;;  %v4240_v27 = vld [vmem:[#allocation5 + $0xa60] ss:$8 sps:$4 sm:$0xff]  }
 0x756   :  { %v1940_v37 = vpop.f32.mrb[16].mxu1 }
 0x757   :  { %v1941_v38 = vadd.f32 %v1940_v37, %v1739_v35  ;;  %v1942_v39 = vpop.f32.mrb[17].mxu1  ;;  %v4221_v35 = vld [vmem:[#allocation5 + $0x9f4] ss:$8 sps:$4 sm:$0xff]   ;;  %v4222_v37 = vld [vmem:[#allocation5 + $0xa00] ss:$8 sps:$4 sm:$0xff]  }
 0x758   :  { %v1943_v40 = vadd.f32 %v1942_v39, %v1743_v36  ;;  %v1944_v41 = vpop.f32.mrb[18].mxu1  ;;  %v4219_v36 = vld [vmem:[#allocation5 + $0x9f0] ss:$8 sps:$4 sm:$0xff]   ;;  %v4227_v39 = vld [vmem:[#allocation5 + $0xa14] ss:$8 sps:$4 sm:$0xff]  }
 0x759   :  { %v1947_v42 = vmax.f32 %v1941_v38, 0.0  ;;  %v1945_v44 = vpop.f32.mrb[19].mxu1  ;;  %v4224_v38 = vld [vmem:[#allocation5 + $0xa04] ss:$8 sps:$4 sm:$0xff]  }
 0x75a   :  { %v1948_v46 = vmax.f32 %v1943_v40, 0.0  ;;  %2922 = vmatprep.subr.bf16.mxu1 %v4224_v38  ;;  %v4225_v40 = vld [vmem:[#allocation5 + $0xa10] ss:$8 sps:$4 sm:$0xff]   ;;  %v4230_v41 = vld [vmem:[#allocation5 + $0xa24] ss:$8 sps:$4 sm:$0xff]  }
 0x75b   :  { %v1982_v48 = vpack.c.bf16 %v1947_v42, %v1947_v42  ;;  %v4228_v42 = vld [vmem:[#allocation5 + $0xa20] ss:$8 sps:$4 sm:$0xff]   ;;  %v4233_v44 = vld [vmem:[#allocation5 + $0xa34] ss:$8 sps:$4 sm:$0xff]  }
 0x75c   :  { %v1983_v47 = vpack.c.bf16 %v1948_v46, %v1948_v46  ;;  %v4231_v46 = vld [vmem:[#allocation5 + $0xa30] ss:$8 sps:$4 sm:$0xff]   ;;  %v4293_v38 = vld [vmem:[#allocation5 + $0xb74] ss:$8 sps:$4 sm:$0xff]  }
 0x75e   :  { %2189 = vmatprep.mubr.bf16.mxu0 %v1983_v47  ;;  %v4236_v47 = vld [vmem:[#allocation5 + $0xa44] ss:$8 sps:$4 sm:$0xff]  }
 0x75f   :  { %2190 = vmatmul.mubr.bf16.vlgmr.msra.gmra.mrb[12].mxu0 %v1982_v48  ;;  %v4234_v48 = vld [vmem:[#allocation5 + $0xa40] ss:$8 sps:$4 sm:$0xff]  }
 0x760   :  { %2660 = vmatpush1.bf16.msra.mxu0 %v4174_v52  ;;  %v4245_v52 = vld [vmem:[#allocation5 + $0xa74] ss:$8 sps:$4 sm:$0xff]  }
 0x761   :  { %2661 = vmatprep.subr.bf16.mxu0 %v4179_v53  ;;  %v2236_v53 = vld [vmem:[#allocation8 + $0x12] sm:$0x3] }
 0x764   :  { %2662 = vmatpush1.bf16.msra.mxu0 %v4177_v54  ;;  %v2241_v54 = vrot.slane %v2236_v53, %v4593_v8 }
 0x765   :  { %2663 = vmatprep.subr.bf16.mxu0 %v4182_v55  ;;  %v2245_v55 = vrot.slane %v2236_v53, %v4595_v10 }
 0x768   :  { %2664 = vmatpush1.bf16.msra.mxu0 %v4180_v56 }
 0x769   :  { %2665 = vmatprep.subr.bf16.mxu0 %v4185_v57 }
 0x76c   :  { %2666 = vmatpush1.bf16.msra.mxu0 %v4183_v59 }
 0x76d   :  { %2667 = vmatprep.subr.bf16.mxu0 %v4188_v61 }
 0x770   :  { %2668 = vmatpush1.bf16.msra.mxu0 %v4186_v62 }
 0x771   :  { %2669 = vmatprep.subr.bf16.mxu0 %v4191_v63 }
 0x774   :  { %2670 = vmatpush1.bf16.msra.mxu0 %v4189_v0 }
 0x775   :  { %2671 = vmatprep.subr.bf16.mxu0 %v4194_v2 }
 0x778   :  { %2672 = vmatpush1.bf16.msra.mxu0 %v4192_v3 }
 0x779   :  { %2673 = vmatprep.subr.bf16.mxu0 %v4197_v43 }
 0x77c   :  { %2674 = vmatpush1.bf16.msra.mxu0 %v4195_v4  ;;  %v4248_v4 = vld [vmem:[#allocation5 + $0xa84] ss:$8 sps:$4 sm:$0xff]  }
 0x77d   :  { %2675 = vmatprep.subr.bf16.mxu0 %v4200_v45  ;;  %v4246_v45 = vld [vmem:[#allocation5 + $0xa80] ss:$8 sps:$4 sm:$0xff]  }
 0x780   :  { %2676 = vmatpush1.bf16.msra.mxu0 %v4198_v5  ;;  %v4251_v5 = vld [vmem:[#allocation5 + $0xa94] ss:$8 sps:$4 sm:$0xff]  }
 0x781   :  { %2677 = vmatprep.subr.bf16.mxu0 %v4203_v6  ;;  %v4249_v6 = vld [vmem:[#allocation5 + $0xa90] ss:$8 sps:$4 sm:$0xff]  }
 0x784   :  { %2678 = vmatpush1.bf16.msra.mxu0 %v4201_v7  ;;  %v4254_v7 = vld [vmem:[#allocation5 + $0xaa4] ss:$8 sps:$4 sm:$0xff]  }
 0x785   :  { %2679 = vmatprep.subr.bf16.mxu0 %v4206_v9  ;;  %v4252_v9 = vld [vmem:[#allocation5 + $0xaa0] ss:$8 sps:$4 sm:$0xff]  }
 0x788   :  { %2680 = vmatpush1.bf16.msra.mxu0 %v4204_v11  ;;  %v4260_v11 = vld [vmem:[#allocation5 + $0xac4] ss:$8 sps:$4 sm:$0xff]  }
 0x789   :  { %2681 = vmatprep.subr.bf16.mxu0 %v4209_v12  ;;  %v4258_v12 = vld [vmem:[#allocation5 + $0xac0] ss:$8 sps:$4 sm:$0xff]  }
 0x78c   :  { %2682 = vmatpush1.bf16.msra.mxu0 %v4207_v13  ;;  %v4261_v13 = vld [vmem:[#allocation5 + $0xad0] ss:$8 sps:$4 sm:$0xff]  }
 0x78d   :  { %2683 = vmatprep.subr.bf16.mxu0 %v4212_v14  ;;  %v4266_v14 = vld [vmem:[#allocation5 + $0xae4] ss:$8 sps:$4 sm:$0xff]  }
 0x790   :  { %2684 = vmatpush1.bf16.msra.mxu0 %v4210_v15  ;;  %v4264_v15 = vld [vmem:[#allocation5 + $0xae0] ss:$8 sps:$4 sm:$0xff]  }
 0x791   :  { %2685 = vmatprep.subr.bf16.mxu0 %v4215_v16  ;;  %v4269_v16 = vld [vmem:[#allocation5 + $0xaf4] ss:$8 sps:$4 sm:$0xff]  }
 0x794   :  { %2686 = vmatpush1.bf16.msra.mxu0 %v4213_v17  ;;  %v4267_v17 = vld [vmem:[#allocation5 + $0xaf0] ss:$8 sps:$4 sm:$0xff]  }
 0x795   :  { %2687 = vmatprep.subr.bf16.mxu0 %v4218_v33  ;;  %v4282_v33 = vld [vmem:[#allocation5 + $0xb40] ss:$8 sps:$4 sm:$0xff]  }
 0x798   :  { %2688 = vmatpush1.bf16.msra.mxu0 %v4216_v34  ;;  %v4287_v34 = vld [vmem:[#allocation5 + $0xb54] ss:$8 sps:$4 sm:$0xff]  }
 0x799   :  { %2689 = vmatprep.subr.bf16.mxu0 %v4221_v35  ;;  %v4285_v35 = vld [vmem:[#allocation5 + $0xb50] ss:$8 sps:$4 sm:$0xff]  }
 0x79c   :  { %2690 = vmatpush1.bf16.msra.mxu0 %v4219_v36  ;;  %v4290_v36 = vld [vmem:[#allocation5 + $0xb64] ss:$8 sps:$4 sm:$0xff]  }
 0x832   :  { %v2191_v21 = vpop.f32.mrb[12].mxu0 }
 0x833   :  { %v2192_v22 = vadd.f32 %v2191_v21, %v1990_v19  ;;  %v2193_v23 = vpop.f32.mrb[13].mxu0  ;;  %v3022_v19 = vcombine.high %v3691_v18, %v3691_v18  ;;  %v4272_v21 = vld [vmem:[#allocation5 + $0xb04] ss:$8 sps:$4 sm:$0xff]  }
 0x834   :  { %v2194_v24 = vadd.f32 %v2193_v23, %v1994_v20  ;;  %v2195_v25 = vpop.f32.mrb[14].mxu0  ;;  %v3029_v20 = vsel %vm3027_vm2, %v3691_v18, 0  ;;  %v4270_v23 = vld [vmem:[#allocation5 + $0xb00] ss:$8 sps:$4 sm:$0xff]  }
 0x835   :  { %v2198_v26 = vmax.f32 %v2192_v22, 0.0  ;;  %v2196_v29 = vpop.f32.mrb[15].mxu0  ;;  %3692 = vmatprep.subr.msk.bf16.mxu0 %vm3027_vm2, %v3022_v19  ;;  %v3012_v22 = vld [vmem:[%s4663_s1] sm:$0xf]  ;;  %v4273_v25 = vld [vmem:[#allocation5 + $0xb10] ss:$8 sps:$4 sm:$0xff]  }
 0x836   :  { %v2199_v30 = vmax.f32 %v2194_v24, 0.0  ;;  %v4275_v24 = vld [vmem:[#allocation5 + $0xb14] ss:$8 sps:$4 sm:$0xff]   ;;  %v4276_v29 = vld [vmem:[#allocation5 + $0xb20] ss:$8 sps:$4 sm:$0xff]  }
 0x837   :  { %v2233_v32 = vpack.c.bf16 %v2198_v26, %v2198_v26  ;;  %v4278_v26 = vld [vmem:[#allocation5 + $0xb24] ss:$8 sps:$4 sm:$0xff]  }
 0x838   :  { %v2234_v31 = vpack.c.bf16 %v2199_v30, %v2199_v30  ;;  %v4281_v30 = vld [vmem:[#allocation5 + $0xb34] ss:$8 sps:$4 sm:$0xff]  }
 0x83a   :  { %2440 = vmatprep.mubr.bf16.mxu1 %v2234_v31  ;;  %v4279_v31 = vld [vmem:[#allocation5 + $0xb30] ss:$8 sps:$4 sm:$0xff]  }
 0x83b   :  { %2441 = vmatmul.mubr.bf16.vlgmr.msra.gmra.mrb[20].mxu1 %v2233_v32  ;;  %v4284_v32 = vld [vmem:[#allocation5 + $0xb44] ss:$8 sps:$4 sm:$0xff]  }
 0x83c   :  { %2923 = vmatpush1.bf16.msra.mxu1 %v4222_v37  ;;  %v4288_v37 = vld [vmem:[#allocation5 + $0xb60] ss:$8 sps:$4 sm:$0xff]  }
 0x83d   :  { %2924 = vmatprep.subr.bf16.mxu1 %v4227_v39  ;;  %v4291_v39 = vld [vmem:[#allocation5 + $0xb70] ss:$8 sps:$4 sm:$0xff]  }
 0x840   :  { %2925 = vmatpush1.bf16.msra.mxu1 %v4225_v40  ;;  %v2487_v40 = vld [vmem:[#allocation8 + $0x14] sm:$0x3] }
 0x841   :  { %2926 = vmatprep.subr.bf16.mxu1 %v4230_v41  ;;  %v2492_v41 = vrot.slane %v2487_v40, %v4593_v8 }
 0x844   :  { %2927 = vmatpush1.bf16.msra.mxu1 %v4228_v42  ;;  %v2496_v42 = vrot.slane %v2487_v40, %v4595_v10  ;;  %v3277_v40 = vld [vmem:[#allocation8 + $0x18] sm:$0x3] }
 0x845   :  { %2928 = vmatprep.subr.bf16.mxu1 %v4233_v44 }
 0x848   :  { %2929 = vmatpush1.bf16.msra.mxu1 %v4231_v46 }
 0x849   :  { %2930 = vmatprep.subr.bf16.mxu1 %v4236_v47 }
 0x84c   :  { %2931 = vmatpush1.bf16.msra.mxu1 %v4234_v48 }
 0x84d   :  { %2932 = vmatprep.subr.bf16.mxu1 %v4239_v49 }
 0x850   :  { %2933 = vmatpush1.bf16.msra.mxu1 %v4237_v50 }
 0x851   :  { %2934 = vmatprep.subr.bf16.mxu1 %v4242_v51 }
 0x854   :  { %2935 = vmatpush1.bf16.msra.mxu1 %v4240_v27 }
 0x855   :  { %2936 = vmatprep.subr.bf16.mxu1 %v4245_v52 }
 0x858   :  { %2937 = vmatpush1.bf16.msra.mxu1 %v4243_v28 }
 0x859   :  { %2938 = vmatprep.subr.bf16.mxu1 %v4248_v4  ;;  %v4300_v4 = vld [vmem:[#allocation5 + $0xba0] ss:$8 sps:$4 sm:$0xff]  }
 0x85c   :  { %2939 = vmatpush1.bf16.msra.mxu1 %v4246_v45  ;;  %v4305_v45 = vld [vmem:[#allocation5 + $0xbb4] ss:$8 sps:$4 sm:$0xff]  }
 0x85d   :  { %2940 = vmatprep.subr.bf16.mxu1 %v4251_v5  ;;  %v4303_v5 = vld [vmem:[#allocation5 + $0xbb0] ss:$8 sps:$4 sm:$0xff]  }
 0x860   :  { %2941 = vmatpush1.bf16.msra.mxu1 %v4249_v6  ;;  %v4308_v6 = vld [vmem:[#allocation5 + $0xbc4] ss:$8 sps:$4 sm:$0xff]  }
 0x861   :  { %2942 = vmatprep.subr.bf16.mxu1 %v4254_v7  ;;  %v4306_v7 = vld [vmem:[#allocation5 + $0xbc0] ss:$8 sps:$4 sm:$0xff]  }
 0x864   :  { %2943 = vmatpush1.bf16.msra.mxu1 %v4252_v9  ;;  %v4311_v9 = vld [vmem:[#allocation5 + $0xbd4] ss:$8 sps:$4 sm:$0xff]  }
 0x90e   :  { %v2442_v56 = vpop.f32.mrb[20].mxu1 }
 0x90f   :  { %v2443_v57 = vadd.f32 %v2442_v56, %v2241_v54  ;;  %v2444_v59 = vpop.f32.mrb[21].mxu1 }
 0x910   :  { %v2445_v61 = vadd.f32 %v2444_v59, %v2245_v55  ;;  %v2446_v62 = vpop.f32.mrb[22].mxu1 }
 0x911   :  { %v2449_v63 = vadd.f32 %v2443_v57, %v4630_v58  ;;  %v2447_v0 = vpop.f32.mrb[23].mxu1  ;;  %v4257_v58 = vld [vmem:[#allocation5 + $0xab4] ss:$8 sps:$4 sm:$0xff]  }
 0x912   :  { %v2450_v2 = vadd.f32 %v2445_v61, %v4633_v60  ;;  %v4255_v60 = vld [vmem:[#allocation5 + $0xab0] ss:$8 sps:$4 sm:$0xff]   ;;  %2944 = vmatprep.subr.bf16.mxu1 %v4257_v58  ;;  %v4294_v0 = vld [vmem:[#allocation5 + $0xb80] ss:$8 sps:$4 sm:$0xff]  }
 0x913   :  { %v2484_v43 = vpack.c.bf16 %v2449_v63, %v2449_v63  ;;  %2945 = vmatpush1.bf16.msra.mxu1 %v4255_v60  ;;  %v4296_v63 = vld [vmem:[#allocation5 + $0xb84] ss:$8 sps:$4 sm:$0xff]   ;;  %v4309_v58 = vld [vmem:[#allocation5 + $0xbd0] ss:$8 sps:$4 sm:$0xff]  }
 0x914   :  { %v2485_v3 = vpack.c.bf16 %v2450_v2, %v2450_v2  ;;  %2946 = vmatprep.subr.bf16.mxu1 %v4260_v11  ;;  %v4299_v2 = vld [vmem:[#allocation5 + $0xb94] ss:$8 sps:$4 sm:$0xff]   ;;  %v4314_v60 = vld [vmem:[#allocation5 + $0xbe4] ss:$8 sps:$4 sm:$0xff]   ;;  %v4312_v11 = vld [vmem:[#allocation5 + $0xbe0] ss:$8 sps:$4 sm:$0xff]  }
 0x916   :  { %2691 = vmatprep.mubr.bf16.mxu0 %v2485_v3  ;;  %v4297_v3 = vld [vmem:[#allocation5 + $0xb90] ss:$8 sps:$4 sm:$0xff]  }
 0x917   :  { %2692 = vmatmul.mubr.bf16.vlgmr.msra.gmra.mrb[16].mxu0 %v2484_v43  ;;  %2947 = vmatpush1.bf16.msra.mxu1 %v4258_v12  ;;  %v4302_v43 = vld [vmem:[#allocation5 + $0xba4] ss:$8 sps:$4 sm:$0xff]   ;;  %v4317_v12 = vld [vmem:[#allocation5 + $0xbf4] ss:$8 sps:$4 sm:$0xff]  }
 0x918   :  { %3066 = vmatprep.mubr.bf16.mxu0 %v4467_v1  ;;  %v4263_v1 = vld [vmem:[#allocation5 + $0xad4] ss:$8 sps:$4 sm:$0xff]   ;;  %3035 = vmatpush1.bf16.msra.mxu0 %v3029_v20 }
 0x919   :  { %2948 = vmatprep.subr.bf16.mxu1 %v4263_v1  ;;  %3235 = vmatprep.subr.bf16.mxu0 %v4272_v21  ;;  %v4315_v1 = vld [vmem:[#allocation5 + $0xbf0] ss:$8 sps:$4 sm:$0xff]  }
 0x91b   :  { %2949 = vmatpush1.bf16.msra.mxu1 %v4261_v13 }
 0x91c   :  { %2950 = vmatprep.subr.bf16.mxu1 %v4266_v14 }
 0x91f   :  { %2951 = vmatpush1.bf16.msra.mxu1 %v4264_v15  ;;  %3693 = vmatmul.mubr.msk.bf16.vlgmr.msra.gmra.mrb[20].mxu0 %vm3023_vm3, %v3012_v22 }
 0x920   :  { %2952 = vmatprep.subr.bf16.mxu1 %v4269_v16  ;;  %3236 = vmatpush1.bf16.msra.mxu0 %v4270_v23 }
 0x921   :  { %3237 = vmatprep.subr.bf16.mxu0 %v4275_v24 }
 0x923   :  { %2953 = vmatpush1.bf16.msra.mxu1 %v4267_v17  ;;  %v2750_v17 = vld [vmem:[#allocation8 + $0x16] sm:$0x3] }
 0x924   :  { %3238 = vmatpush1.bf16.msra.mxu0 %v4273_v25  ;;  %v2755_v18 = vrot.slane %v2750_v17, %v4593_v8  ;;  %v2759_v19 = vrot.slane %v2750_v17, %v4595_v10 }
 0x925   :  { %3239 = vmatprep.subr.bf16.mxu0 %v4278_v26 }
 0x928   :  { %3240 = vmatpush1.bf16.msra.mxu0 %v4276_v29 }
 0x929   :  { %3241 = vmatprep.subr.bf16.mxu0 %v4281_v30 }
 0x92c   :  { %3242 = vmatpush1.bf16.msra.mxu0 %v4279_v31 }
 0x92d   :  { %3243 = vmatprep.subr.bf16.mxu0 %v4284_v32 }
 0x930   :  { %3244 = vmatpush1.bf16.msra.mxu0 %v4282_v33 }
 0x931   :  { %3245 = vmatprep.subr.bf16.mxu0 %v4287_v34 }
 0x934   :  { %3246 = vmatpush1.bf16.msra.mxu0 %v4285_v35 }
 0x935   :  { %3247 = vmatprep.subr.bf16.mxu0 %v4290_v36 }
 0x938   :  { %3248 = vmatpush1.bf16.msra.mxu0 %v4288_v37 }
 0x939   :  { %3249 = vmatprep.subr.bf16.mxu0 %v4293_v38 }
 0x93c   :  { %3250 = vmatpush1.bf16.msra.mxu0 %v4291_v39 }
 0x93d   :  { %3251 = vmatprep.subr.bf16.mxu0 %v4296_v63 }
 0x940   :  { %3252 = vmatpush1.bf16.msra.mxu0 %v4294_v0 }
 0x941   :  { %3253 = vmatprep.subr.bf16.mxu0 %v4299_v2 }
 0x944   :  { %3254 = vmatpush1.bf16.msra.mxu0 %v4297_v3 }
 0x945   :  { %3255 = vmatprep.subr.bf16.mxu0 %v4302_v43 }
 0x948   :  { %3256 = vmatpush1.bf16.msra.mxu0 %v4300_v4 }
 0x949   :  { %3257 = vmatprep.subr.bf16.mxu0 %v4305_v45 }
 0x94c   :  { %3258 = vmatpush1.bf16.msra.mxu0 %v4303_v5 }
 0x94d   :  { %3259 = vmatprep.subr.bf16.mxu0 %v4308_v6 }
 0x950   :  { %3260 = vmatpush1.bf16.msra.mxu0 %v4306_v7 }
 0x951   :  { %3261 = vmatprep.subr.bf16.mxu0 %v4311_v9 }
 0x954   :  { %3262 = vmatpush1.bf16.msra.mxu0 %v4309_v58 }
 0x955   :  { %3263 = vmatprep.subr.bf16.mxu0 %v4314_v60 }
 0x958   :  { %3264 = vmatpush1.bf16.msra.mxu0 %v4312_v11 }
 0x959   :  { %3265 = vmatprep.subr.bf16.mxu0 %v4317_v12 }
 0x95c   :  { %3266 = vmatpush1.bf16.msra.mxu0 %v4315_v1 }
 0x9ea   :  { %v2693_v44 = vpop.f32.mrb[16].mxu0 }
 0x9eb   :  { %v2694_v46 = vadd.f32 %v2693_v44, %v2492_v41  ;;  %v2695_v47 = vpop.f32.mrb[17].mxu0  ;;  %v3282_v41 = vrot.slane %v3277_v40, %v4593_v8  ;;  %v3286_v44 = vrot.slane %v3277_v40, %v4595_v10 }
 0x9ec   :  { %v2696_v48 = vadd.f32 %v2695_v47, %v2496_v42  ;;  %v2697_v49 = vpop.f32.mrb[18].mxu0 }
 0x9ed   :  { %v3655_v50 = vmul.f32 -1.442695, %v2694_v46  ;;  %v2698_v51 = vpop.f32.mrb[19].mxu0 }
 0x9ee   :  { %v3656_v27 = vmul.f32 -1.442695, %v2696_v48 }
 0x9ef   :  { %4326 = vpow2.f32 %v3655_v50 }
 0x9f0   :  { %4328 = vpow2.f32 %v3656_v27 }
 0x9f2   :  { %v3068_v13 = vpop.f32.mrb[20].mxu0 }
 0x9f3   :  { %v3070_v14 = vpop.f32.mrb[21].mxu0 }
 0x9f4   :  { %v3072_v15 = vpop.f32.mrb[22].mxu0 }
 0x9f5   :  { %v3073_v16 = vpop.f32.mrb[23].mxu0 }
 0x9f9   :  { %v4327_v52 = vpop.eup %4326 }
 0x9fa   :  { %v4329_v28 = vpop.eup %4328  ;;  %v2706_v53 = vadd.f32 1.0, %v4327_v52 }
 0x9fb   :  { %v2707_v54 = vadd.f32 1.0, %v4329_v28 }
 0x9fc   :  { %4330 = vrcp.f32 %v2706_v53 }
 0x9fd   :  { %4332 = vrcp.f32 %v2707_v54 }
 0xa06   :  { %v4331_v55 = vpop.eup %4330 }
 0xa07   :  { %v4333_v56 = vpop.eup %4332  ;;  %v2712_v57 = vmul.f32 %v4331_v55, %v2694_v46  ;;  %v3293_v46 = vld [vmem:[#allocation10] sm:$0x3] }
 0xa08   :  { %v2713_v59 = vmul.f32 %v4333_v56, %v2696_v48  ;;  %v3298_v52 = vrot.slane %v3293_v46, %v4593_v8  ;;  %v3302_v53 = vrot.slane %v3293_v46, %v4595_v10 }
 0xa09   :  { %v2747_v62 = vpack.c.bf16 %v2712_v57, %v2712_v57 }
 0xa0a   :  { %v2748_v61 = vpack.c.bf16 %v2713_v59, %v2713_v59 }
 0xa0c   :  { %2954 = vmatprep.mubr.bf16.mxu1 %v2748_v61  ;;  %v3726_v61 = vld [vmem:[#allocation2] ss:$0 sm:$0xff] }
 0xa0d   :  { %2955 = vmatmul.mubr.bf16.vlgmr.msra.gmra.mrb[24].mxu1 %v2747_v62 }
 0xae0   :  { %v2956_v20 = vpop.f32.mrb[24].mxu1 }
 0xae1   :  { %v2957_v21 = vadd.f32 %v2956_v20, %v2755_v18  ;;  %v2958_v22 = vpop.f32.mrb[25].mxu1 }
 0xae2   :  { %v2959_v23 = vadd.f32 %v2958_v22, %v2759_v19  ;;  %v2960_v24 = vpop.f32.mrb[26].mxu1 }
 0xae3   :  { %v3689_v25 = vmul.f32 -1.442695, %v2957_v21  ;;  %v2961_v26 = vpop.f32.mrb[27].mxu1 }
 0xae4   :  { %v3690_v29 = vmul.f32 -1.442695, %v2959_v23 }
 0xae5   :  { %4334 = vpow2.f32 %v3689_v25 }
 0xae6   :  { %4336 = vpow2.f32 %v3690_v29 }
 0xaef   :  { %v4335_v30 = vpop.eup %4334 }
 0xaf0   :  { %v4337_v31 = vpop.eup %4336  ;;  %v2969_v32 = vadd.f32 1.0, %v4335_v30 }
 0xaf1   :  { %v2970_v33 = vadd.f32 1.0, %v4337_v31 }
 0xaf2   :  { %4338 = vrcp.f32 %v2969_v32 }
 0xaf3   :  { %4340 = vrcp.f32 %v2970_v33 }
 0xafc   :  { %v4339_v34 = vpop.eup %4338 }
 0xafd   :  { %v4341_v35 = vpop.eup %4340  ;;  %v2975_v36 = vmul.f32 %v4339_v34, %v2957_v21 }
 0xafe   :  { %v2976_v37 = vmul.f32 %v4341_v35, %v2959_v23 }
 0xaff   :  { %v3010_v39 = vpack.c.bf16 %v2975_v36, %v2975_v36 }
 0xb00   :  { %v3011_v38 = vpack.c.bf16 %v2976_v37, %v2976_v37 }
 0xb02   :  { %3267 = vmatprep.mubr.bf16.mxu0 %v3011_v38 }
 0xb03   :  { %3268 = vmatmul.mubr.bf16.vlgmr.msra.gmra.mrb[24].mxu0 %v3010_v39 }
 0xbd6   :  { %v3269_v42 = vpop.f32.mrb[24].mxu0 }
 0xbd7   :  { %v3270_v47 = vadd.f32 %v3269_v42, %v3068_v13  ;;  %v3271_v48 = vpop.f32.mrb[25].mxu0 }
 0xbd8   :  { %v3272_v49 = vadd.f32 %v3271_v48, %v3070_v14  ;;  %v3273_v50 = vpop.f32.mrb[26].mxu0 }
 0xbd9   :  { %v3289_v51 = vadd.f32 %v3282_v41, %v3270_v47  ;;  %v3274_v27 = vpop.f32.mrb[27].mxu0 }
 0xbda   :  { %v3290_v28 = vadd.f32 %v3286_v44, %v3272_v49 }
 0xbdb   :  { %v3291_v54 = vmax.f32 %v3289_v51, 0.0 }
 0xbdc   :  { %v3292_v55 = vmax.f32 %v3290_v28, 0.0 }
 0xbdd   :  { %v3305_v56 = vmul.f32 %v3298_v52, %v3291_v54 }
 0xbde   :  { %v3306_v57 = vmul.f32 %v3302_v53, %v3292_v55 }
 0xbe0   :  { %v3307_v59 = vadd.f32 %v3306_v57, %v3305_v56 }
 0xbe2   :  { %3308 = vadd.xlane.f32.xlu0 %v3307_v59 }
 0xc6f   :  { %v3309_v62 = vpop.xlane.xlu0 %3308 }
 0xc70   :  { %v3317_v63 = vadd.f32 %v3726_v61, %v3309_v62 }
 0xc72   :  { %3319 = vst.msk [vmem:[%s4670_s8] sm:$0xff] %vm3318_vm4, %v3317_v63 }
 0xc73   :  { %3324 = vsyncpa [#allocation4], 1 }
 0xc74   :  { %3325 = vsyncpa [#allocation6], 1 }
 0xc75   :  { %3326 = vsyncpa [#allocation9], 1 }

</bundles_post_ra>
